<compile_context>
chip_gen: v7x
topology: tpu7x:2x2x1
jax: 0.10.0
libtpu: 0.0.40
codegen_flags: <defaults>
</compile_context>

<pallas_src>
import jax
import jax.numpy as jnp
from jax.experimental import pallas as pl
from jax.experimental.pallas import tpu as pltpu

EPS = 1e-5                       # nn.BatchNorm2d default eps
VMEM_LIMIT = 32 * 1024 * 1024    # explicit budget, safe on v5e/v6e/v7x


def _round_up(x, m):
    return ((x + m - 1) // m) * m


# --------------------------------------------------------------------------
# Kernel 1: fused 3x3 conv (padding=1) + bias, per-row tap accumulation.
# --------------------------------------------------------------------------

def _conv3x3_row_kernel(x0_ref, x1_ref, x2_ref, w_ref, b_ref, o_ref):
    # x*_ref : (Wp, Cin) bf16  -- three vertically adjacent rows of the padded input
    # w_ref  : (9, Cin, Cout) bf16   (tap index = dh*3 + dw)
    # b_ref  : (1, Cout) f32
    # o_ref  : (W, Cout) f32   -- one output row
    W, Cout = o_ref.shape
    rows = (x0_ref, x1_ref, x2_ref)
    acc = jnp.zeros((W, Cout), jnp.float32)
    for dh in range(3):
        for dw in range(3):
            patch = rows[dh][pl.ds(dw, W), :]            # (W, Cin) bf16, static offset
            acc = acc + jnp.dot(patch, w_ref[dh * 3 + dw],
                                preferred_element_type=jnp.float32)
    o_ref[...] = acc + b_ref[...]


def conv3x3_bias(x, w9, bias):
    """x: (B, H, W, Cin) float; w9: (9, Cin, Cout) bf16; bias: (1, Cout) f32."""
    B, H, W, Cin = x.shape
    Cout = w9.shape[-1]
    xp = jnp.pad(x.astype(jnp.bfloat16), ((0, 0), (1, 1), (1, 1), (0, 0)))
    Wp = W + 2

    def x_spec(dh):
        return pl.BlockSpec((None, None, Wp, Cin),
                            lambda b, h, dh=dh: (b, h + dh, 0, 0))

    return pl.pallas_call(
        _conv3x3_row_kernel,
        out_shape=jax.ShapeDtypeStruct((B, H, W, Cout), jnp.float32),
        grid=(B, H),
        in_specs=[
            x_spec(0), x_spec(1), x_spec(2),
            pl.BlockSpec((9, Cin, Cout), lambda b, h: (0, 0, 0)),
            pl.BlockSpec((1, Cout), lambda b, h: (0, 0)),
        ],
        out_specs=pl.BlockSpec((None, None, W, Cout), lambda b, h: (b, h, 0, 0)),
        compiler_params=pltpu.CompilerParams(
            dimension_semantics=("parallel", "parallel"),
            vmem_limit_bytes=VMEM_LIMIT),
    )(xp, xp, xp, w9, bias)


# --------------------------------------------------------------------------
# Kernel 2: tiled per-channel sum / sum-of-squares reduction (BN statistics).
# --------------------------------------------------------------------------

def _stats_kernel(y_ref, sum_ref, sq_ref):
    @pl.when(pl.program_id(0) == 0)
    def _():
        sum_ref[...] = jnp.zeros_like(sum_ref)
        sq_ref[...] = jnp.zeros_like(sq_ref)
    y = y_ref[...]
    sum_ref[...] += jnp.sum(y, axis=0, keepdims=True)
    sq_ref[...] += jnp.sum(y * y, axis=0, keepdims=True)


# --------------------------------------------------------------------------
# Kernel 3: tiled per-channel affine (BN scale/shift) + ReLU apply.
# --------------------------------------------------------------------------

def _affine_relu_kernel(y_ref, s_ref, t_ref, o_ref):
    o_ref[...] = jnp.maximum(y_ref[...] * s_ref[...] + t_ref[...],
                             0.0).astype(o_ref.dtype)


def batchnorm_relu(y, gamma, beta, out_dtype=jnp.float32, tile_rows=256):
    """Training-mode BatchNorm (batch statistics, biased var) + ReLU, tiled."""
    B, H, W, C = y.shape
    M = B * H * W
    yf = y.reshape(M, C)
    tm = min(tile_rows, _round_up(M, 8))
    Mp = _round_up(M, tm)
    yp = jnp.pad(yf, ((0, Mp - M), (0, 0)))   # zero pad rows: no effect on sums

    s, sq = pl.pallas_call(
        _stats_kernel,
        out_shape=(jax.ShapeDtypeStruct((1, C), jnp.float32),
                   jax.ShapeDtypeStruct((1, C), jnp.float32)),
        grid=(Mp // tm,),
        in_specs=[pl.BlockSpec((tm, C), lambda i: (i, 0))],
        out_specs=(pl.BlockSpec((1, C), lambda i: (0, 0)),
                   pl.BlockSpec((1, C), lambda i: (0, 0))),
        compiler_params=pltpu.CompilerParams(
            dimension_semantics=("arbitrary",),
            vmem_limit_bytes=VMEM_LIMIT),
    )(yp)

    # O(C) finalization in plain JAX (tiny):
    mean = s / M
    var = sq / M - mean * mean                 # biased variance (torch training mode)
    scale = gamma.reshape(1, C) * jax.lax.rsqrt(var + EPS)
    shift = beta.reshape(1, C) - mean * scale

    out = pl.pallas_call(
        _affine_relu_kernel,
        out_shape=jax.ShapeDtypeStruct((Mp, C), out_dtype),
        grid=(Mp // tm,),
        in_specs=[pl.BlockSpec((tm, C), lambda i: (i, 0)),
                  pl.BlockSpec((1, C), lambda i: (0, 0)),
                  pl.BlockSpec((1, C), lambda i: (0, 0))],
        out_specs=pl.BlockSpec((tm, C), lambda i: (i, 0)),
        compiler_params=pltpu.CompilerParams(
            dimension_semantics=("parallel",),
            vmem_limit_bytes=VMEM_LIMIT),
    )(yp, scale, shift)
    return out[:M].reshape(B, H, W, C)


# --------------------------------------------------------------------------
# Parameters (PyTorch layout) and one-time preparation for the kernels.
# --------------------------------------------------------------------------

def init_conv_block_params(key, in_ch, out_ch):
    k1, k2, k3, k4 = jax.random.split(key, 4)

    def conv_w(k, cin, cout):
        return jax.random.normal(k, (cout, cin, 3, 3), jnp.float32) / jnp.sqrt(cin * 9.0)

    return {
        "w1": conv_w(k1, in_ch, out_ch),
        "b1": 0.01 * jax.random.normal(k2, (out_ch,), jnp.float32),
        "g1": jnp.ones((out_ch,), jnp.float32),
        "be1": jnp.zeros((out_ch,), jnp.float32),
        "w2": conv_w(k3, out_ch, out_ch),
        "b2": 0.01 * jax.random.normal(k4, (out_ch,), jnp.float32),
        "g2": jnp.ones((out_ch,), jnp.float32),
        "be2": jnp.zeros((out_ch,), jnp.float32),
    }


def prepare_params(p):
    """One-time: torch (Cout,Cin,3,3) -> (9,Cin,Cout) bf16; bias -> (1,Cout) f32."""
    def prep_w(w):
        cout, cin = w.shape[0], w.shape[1]
        return jnp.transpose(w, (2, 3, 1, 0)).reshape(9, cin, cout).astype(jnp.bfloat16)

    return {
        "w1": prep_w(p["w1"]), "b1": p["b1"].reshape(1, -1).astype(jnp.float32),
        "g1": p["g1"], "be1": p["be1"],
        "w2": prep_w(p["w2"]), "b2": p["b2"].reshape(1, -1).astype(jnp.float32),
        "g2": p["g2"], "be2": p["be2"],
    }


# --------------------------------------------------------------------------
# conv_block forward (NCHW in / NCHW out, like the PyTorch module).
# --------------------------------------------------------------------------

def conv_block_forward(p, x_nchw):
    x = jnp.transpose(x_nchw.astype(jnp.float32), (0, 2, 3, 1))      # NCHW -> NHWC
    y1 = conv3x3_bias(x, p["w1"], p["b1"])
    a1 = batchnorm_relu(y1, p["g1"], p["be1"], out_dtype=jnp.bfloat16)
    y2 = conv3x3_bias(a1, p["w2"], p["b2"])
    out = batchnorm_relu(y2, p["g2"], p["be2"], out_dtype=jnp.float32)
    return jnp.transpose(out, (0, 3, 1, 2))                          # NHWC -> NCHW


# --------------------------------------------------------------------------
# Pure-JAX reference (spec) for a sanity check.
# --------------------------------------------------------------------------

def conv_block_reference(p, x_nchw):
    def conv_bn_relu(x, w, b, g, be):
        y = jax.lax.conv_general_dilated(
            x, w, window_strides=(1, 1), padding="SAME",
            dimension_numbers=("NCHW", "OIHW", "NCHW"))
        y = y + b[None, :, None, None]
        mean = jnp.mean(y, axis=(0, 2, 3), keepdims=True)
        var = jnp.var(y, axis=(0, 2, 3), keepdims=True)      # biased, like torch train()
        y = (y - mean) * jax.lax.rsqrt(var + EPS)
        y = y * g[None, :, None, None] + be[None, :, None, None]
        return jnp.maximum(y, 0.0)

    x = x_nchw.astype(jnp.float32)
    x = conv_bn_relu(x, p["w1"], p["b1"], p["g1"], p["be1"])
    x = conv_bn_relu(x, p["w2"], p["b2"], p["g2"], p["be2"])
    return x


if __name__ == "__main__":
    key = jax.random.PRNGKey(0)
    pkey, xkey = jax.random.split(key)

    in_ch, out_ch = 4, 8
    params = init_conv_block_params(pkey, in_ch, out_ch)
    prep = prepare_params(params)                       # one-time weight prep
    x = jax.random.normal(xkey, (2, in_ch, 16, 16), jnp.float32)   # NCHW like PyTorch

    fwd = jax.jit(conv_block_forward)
    out = fwd(prep, x)
    out = jax.block_until_ready(out)

    assert out.shape == (2, out_ch, 16, 16), out.shape
    assert bool(jnp.all(jnp.isfinite(out)))
    assert bool(jnp.all(out >= 0.0))                    # ReLU output

    # Loose tolerance: kernel matmuls use bf16 operands (f32 accumulation).
    ref = conv_block_reference(params, x)
    err = float(jnp.max(jnp.abs(out - ref)))
    assert err < 1e-1, f"max abs error vs reference: {err}"

    print("KERNEL_OK")
</pallas_src>

<mosaic_0001>
module attributes {stable_mosaic.version = 11 : i64} {
  func.func @_stats_kernel(%arg0: i32, %arg1: memref<256x8xf32, #tpu.memory_space<vmem>>, %arg2: memref<1x8xf32, #tpu.memory_space<vmem>>, %arg3: memref<1x8xf32, #tpu.memory_space<vmem>>) attributes {dimension_semantics = [#tpu.dimension_semantics<arbitrary>], iteration_bounds = array<i64: 2>, scalar_prefetch = 0 : i64, scratch_operands = 0 : i64, tpu.core_type = #tpu.core_type<tc>, window_params = [{transform_indices = @transform_0, window_bounds = array<i64: 256, 8>}, {pipeline_mode = #tpu.pipeline_mode<synchronous>, transform_indices = @transform_1, window_bounds = array<i64: 1, 8>}, {pipeline_mode = #tpu.pipeline_mode<synchronous>, transform_indices = @transform_2, window_bounds = array<i64: 1, 8>}]} {
    %c0_i32 = arith.constant 0 : i32
    %0 = arith.cmpi eq, %arg0, %c0_i32 : i32
    %1 = arith.extui %0 : i1 to i32
    %c0_i32_0 = arith.constant 0 : i32
    %2 = arith.cmpi ne, %1, %c0_i32_0 : i32
    scf.if %2 {
      %cst_11 = arith.constant 0.000000e+00 : f32
      %15 = vector.broadcast %cst_11 : f32 to vector<1x8xf32>
      %c0_12 = arith.constant 0 : index
      %c0_13 = arith.constant 0 : index
      %16 = vector.load %arg2[%c0_12, %c0_13] : memref<1x8xf32, #tpu.memory_space<vmem>>, vector<1x8xf32>
      tpu.vector_store %arg2[%c0_12, %c0_13], %15 {strides = array<i32>} : memref<1x8xf32, #tpu.memory_space<vmem>>, vector<1x8xf32>,
      %cst_14 = arith.constant 0.000000e+00 : f32
      %17 = vector.broadcast %cst_14 : f32 to vector<1x8xf32>
      %c0_15 = arith.constant 0 : index
      %c0_16 = arith.constant 0 : index
      %18 = vector.load %arg3[%c0_15, %c0_16] : memref<1x8xf32, #tpu.memory_space<vmem>>, vector<1x8xf32>
      tpu.vector_store %arg3[%c0_15, %c0_16], %17 {strides = array<i32>} : memref<1x8xf32, #tpu.memory_space<vmem>>, vector<1x8xf32>,
    } else {
    }
    %c0 = arith.constant 0 : index
    %c0_1 = arith.constant 0 : index
    %3 = vector.load %arg1[%c0, %c0_1] : memref<256x8xf32, #tpu.memory_space<vmem>>, vector<256x8xf32>
    %c0_2 = arith.constant 0 : index
    %c0_3 = arith.constant 0 : index
    %4 = vector.load %arg2[%c0_2, %c0_3] : memref<1x8xf32, #tpu.memory_space<vmem>>, vector<1x8xf32>
    %cst = arith.constant dense<0.000000e+00> : vector<8xf32>
    %5 = vector.multi_reduction <add>, %3, %cst [0] : vector<256x8xf32> to vector<8xf32>
    %6 = vector.shape_cast %5 : vector<8xf32> to vector<1x8xf32>
    %7 = arith.addf %4, %6 : vector<1x8xf32>
    %c0_4 = arith.constant 0 : index
    %c0_5 = arith.constant 0 : index
    %8 = vector.load %arg2[%c0_4, %c0_5] : memref<1x8xf32, #tpu.memory_space<vmem>>, vector<1x8xf32>
    tpu.vector_store %arg2[%c0_4, %c0_5], %7 {strides = array<i32>} : memref<1x8xf32, #tpu.memory_space<vmem>>, vector<1x8xf32>,
    %c0_6 = arith.constant 0 : index
    %c0_7 = arith.constant 0 : index
    %9 = vector.load %arg3[%c0_6, %c0_7] : memref<1x8xf32, #tpu.memory_space<vmem>>, vector<1x8xf32>
    %10 = arith.mulf %3, %3 : vector<256x8xf32>
    %cst_8 = arith.constant dense<0.000000e+00> : vector<8xf32>
    %11 = vector.multi_reduction <add>, %10, %cst_8 [0] : vector<256x8xf32> to vector<8xf32>
    %12 = vector.shape_cast %11 : vector<8xf32> to vector<1x8xf32>
    %13 = arith.addf %9, %12 : vector<1x8xf32>
    %c0_9 = arith.constant 0 : index
    %c0_10 = arith.constant 0 : index
    %14 = vector.load %arg3[%c0_9, %c0_10] : memref<1x8xf32, #tpu.memory_space<vmem>>, vector<1x8xf32>
    tpu.vector_store %arg3[%c0_9, %c0_10], %13 {strides = array<i32>} : memref<1x8xf32, #tpu.memory_space<vmem>>, vector<1x8xf32>,
    return
  }
  func.func @transform_0(%arg0: i32) -> (i32, i32) {
    %c0_i32 = arith.constant 0 : i32
    %c0_i32_0 = arith.constant 0 : i32
    return %arg0, %c0_i32 : i32, i32
  }
  func.func @transform_1(%arg0: i32) -> (i32, i32) {
    %c0_i32 = arith.constant 0 : i32
    %c0_i32_0 = arith.constant 0 : i32
    %c0_i32_1 = arith.constant 0 : i32
    return %c0_i32, %c0_i32_0 : i32, i32
  }
  func.func @transform_2(%arg0: i32) -> (i32, i32) {
    %c0_i32 = arith.constant 0 : i32
    %c0_i32_0 = arith.constant 0 : i32
    %c0_i32_1 = arith.constant 0 : i32
    return %c0_i32, %c0_i32_0 : i32, i32
  }
}

module attributes {stable_mosaic.version = 11 : i64} {
  func.func @_conv3x3_row_kernel(%arg0: i32, %arg1: i32, %arg2: memref<1x1x18x4xbf16, #tpu.memory_space<vmem>>, %arg3: memref<1x1x18x4xbf16, #tpu.memory_space<vmem>>, %arg4: memref<1x1x18x4xbf16, #tpu.memory_space<vmem>>, %arg5: memref<9x4x8xbf16, #tpu.memory_space<vmem>>, %arg6: memref<1x8xf32, #tpu.memory_space<vmem>>, %arg7: memref<1x1x16x8xf32, #tpu.memory_space<vmem>>) attributes {dimension_semantics = [#tpu.dimension_semantics<parallel>, #tpu.dimension_semantics<parallel>], iteration_bounds = array<i64: 2, 16>, scalar_prefetch = 0 : i64, scratch_operands = 0 : i64, tpu.core_type = #tpu.core_type<tc>, window_params = [{transform_indices = @transform_0, window_bounds = array<i64: 1, 1, 18, 4>}, {transform_indices = @transform_1, window_bounds = array<i64: 1, 1, 18, 4>}, {transform_indices = @transform_2, window_bounds = array<i64: 1, 1, 18, 4>}, {pipeline_mode = #tpu.pipeline_mode<synchronous>, transform_indices = @transform_3, window_bounds = array<i64: 9, 4, 8>}, {pipeline_mode = #tpu.pipeline_mode<synchronous>, transform_indices = @transform_4, window_bounds = array<i64: 1, 8>}, {transform_indices = @transform_5, window_bounds = array<i64: 1, 1, 16, 8>}]} {
    %cst = arith.constant 0.000000e+00 : f32
    %0 = vector.broadcast %cst : f32 to vector<16x8xf32>
    %c0 = arith.constant 0 : index
    %c0_0 = arith.constant 0 : index
    %c0_1 = arith.constant 0 : index
    %c0_2 = arith.constant 0 : index
    %1 = vector.load %arg2[%c0, %c0_0, %c0_1, %c0_2] : memref<1x1x18x4xbf16, #tpu.memory_space<vmem>>, vector<1x1x16x4xbf16>
    %2 = vector.shape_cast %1 : vector<1x1x16x4xbf16> to vector<16x4xbf16>
    %c0_3 = arith.constant 0 : index
    %c0_4 = arith.constant 0 : index
    %c0_5 = arith.constant 0 : index
    %3 = vector.load %arg5[%c0_3, %c0_4, %c0_5] : memref<9x4x8xbf16, #tpu.memory_space<vmem>>, vector<1x4x8xbf16>
    %4 = vector.shape_cast %3 : vector<1x4x8xbf16> to vector<4x8xbf16>
    %cst_6 = arith.constant dense<0.000000e+00> : vector<16x8xf32>
    %5 = tpu.matmul %2, %4, %cst_6 {dimension_numbers = #tpu.dot_dimension_numbers<[1], [0], [0], [1], [0, 0, 1, 1], [], []>} : vector<16x4xbf16>, vector<4x8xbf16>, vector<16x8xf32> -> vector<16x8xf32>
    %6 = arith.addf %0, %5 : vector<16x8xf32>
    %c0_7 = arith.constant 0 : index
    %c0_8 = arith.constant 0 : index
    %c1 = arith.constant 1 : index
    %c0_9 = arith.constant 0 : index
    %7 = vector.load %arg2[%c0_7, %c0_8, %c1, %c0_9] : memref<1x1x18x4xbf16, #tpu.memory_space<vmem>>, vector<1x1x16x4xbf16>
    %8 = vector.shape_cast %7 : vector<1x1x16x4xbf16> to vector<16x4xbf16>
    %c1_10 = arith.constant 1 : index
    %c0_11 = arith.constant 0 : index
    %c0_12 = arith.constant 0 : index
    %9 = vector.load %arg5[%c1_10, %c0_11, %c0_12] : memref<9x4x8xbf16, #tpu.memory_space<vmem>>, vector<1x4x8xbf16>
    %10 = vector.shape_cast %9 : vector<1x4x8xbf16> to vector<4x8xbf16>
    %cst_13 = arith.constant dense<0.000000e+00> : vector<16x8xf32>
    %11 = tpu.matmul %8, %10, %cst_13 {dimension_numbers = #tpu.dot_dimension_numbers<[1], [0], [0], [1], [0, 0, 1, 1], [], []>} : vector<16x4xbf16>, vector<4x8xbf16>, vector<16x8xf32> -> vector<16x8xf32>
    %12 = arith.addf %6, %11 : vector<16x8xf32>
    %c0_14 = arith.constant 0 : index
    %c0_15 = arith.constant 0 : index
    %c2 = arith.constant 2 : index
    %c0_16 = arith.constant 0 : index
    %13 = vector.load %arg2[%c0_14, %c0_15, %c2, %c0_16] : memref<1x1x18x4xbf16, #tpu.memory_space<vmem>>, vector<1x1x16x4xbf16>
    %14 = vector.shape_cast %13 : vector<1x1x16x4xbf16> to vector<16x4xbf16>
    %c2_17 = arith.constant 2 : index
    %c0_18 = arith.constant 0 : index
    %c0_19 = arith.constant 0 : index
    %15 = vector.load %arg5[%c2_17, %c0_18, %c0_19] : memref<9x4x8xbf16, #tpu.memory_space<vmem>>, vector<1x4x8xbf16>
    %16 = vector.shape_cast %15 : vector<1x4x8xbf16> to vector<4x8xbf16>
    %cst_20 = arith.constant dense<0.000000e+00> : vector<16x8xf32>
    %17 = tpu.matmul %14, %16, %cst_20 {dimension_numbers = #tpu.dot_dimension_numbers<[1], [0], [0], [1], [0, 0, 1, 1], [], []>} : vector<16x4xbf16>, vector<4x8xbf16>, vector<16x8xf32> -> vector<16x8xf32>
    %18 = arith.addf %12, %17 : vector<16x8xf32>
    %c0_21 = arith.constant 0 : index
    %c0_22 = arith.constant 0 : index
    %c0_23 = arith.constant 0 : index
    %c0_24 = arith.constant 0 : index
    %19 = vector.load %arg3[%c0_21, %c0_22, %c0_23, %c0_24] : memref<1x1x18x4xbf16, #tpu.memory_space<vmem>>, vector<1x1x16x4xbf16>
    %20 = vector.shape_cast %19 : vector<1x1x16x4xbf16> to vector<16x4xbf16>
    %c3 = arith.constant 3 : index
    %c0_25 = arith.constant 0 : index
    %c0_26 = arith.constant 0 : index
    %21 = vector.load %arg5[%c3, %c0_25, %c0_26] : memref<9x4x8xbf16, #tpu.memory_space<vmem>>, vector<1x4x8xbf16>
    %22 = vector.shape_cast %21 : vector<1x4x8xbf16> to vector<4x8xbf16>
    %cst_27 = arith.constant dense<0.000000e+00> : vector<16x8xf32>
    %23 = tpu.matmul %20, %22, %cst_27 {dimension_numbers = #tpu.dot_dimension_numbers<[1], [0], [0], [1], [0, 0, 1, 1], [], []>} : vector<16x4xbf16>, vector<4x8xbf16>, vector<16x8xf32> -> vector<16x8xf32>
    %24 = arith.addf %18, %23 : vector<16x8xf32>
    %c0_28 = arith.constant 0 : index
    %c0_29 = arith.constant 0 : index
    %c1_30 = arith.constant 1 : index
    %c0_31 = arith.constant 0 : index
    %25 = vector.load %arg3[%c0_28, %c0_29, %c1_30, %c0_31] : memref<1x1x18x4xbf16, #tpu.memory_space<vmem>>, vector<1x1x16x4xbf16>
    %26 = vector.shape_cast %25 : vector<1x1x16x4xbf16> to vector<16x4xbf16>
    %c4 = arith.constant 4 : index
    %c0_32 = arith.constant 0 : index
    %c0_33 = arith.constant 0 : index
    %27 = vector.load %arg5[%c4, %c0_32, %c0_33] : memref<9x4x8xbf16, #tpu.memory_space<vmem>>, vector<1x4x8xbf16>
    %28 = vector.shape_cast %27 : vector<1x4x8xbf16> to vector<4x8xbf16>
    %cst_34 = arith.constant dense<0.000000e+00> : vector<16x8xf32>
    %29 = tpu.matmul %26, %28, %cst_34 {dimension_numbers = #tpu.dot_dimension_numbers<[1], [0], [0], [1], [0, 0, 1, 1], [], []>} : vector<16x4xbf16>, vector<4x8xbf16>, vector<16x8xf32> -> vector<16x8xf32>
    %30 = arith.addf %24, %29 : vector<16x8xf32>
    %c0_35 = arith.constant 0 : index
    %c0_36 = arith.constant 0 : index
    %c2_37 = arith.constant 2 : index
    %c0_38 = arith.constant 0 : index
    %31 = vector.load %arg3[%c0_35, %c0_36, %c2_37, %c0_38] : memref<1x1x18x4xbf16, #tpu.memory_space<vmem>>, vector<1x1x16x4xbf16>
    %32 = vector.shape_cast %31 : vector<1x1x16x4xbf16> to vector<16x4xbf16>
    %c5 = arith.constant 5 : index
    %c0_39 = arith.constant 0 : index
    %c0_40 = arith.constant 0 : index
    %33 = vector.load %arg5[%c5, %c0_39, %c0_40] : memref<9x4x8xbf16, #tpu.memory_space<vmem>>, vector<1x4x8xbf16>
    %34 = vector.shape_cast %33 : vector<1x4x8xbf16> to vector<4x8xbf16>
    %cst_41 = arith.constant dense<0.000000e+00> : vector<16x8xf32>
    %35 = tpu.matmul %32, %34, %cst_41 {dimension_numbers = #tpu.dot_dimension_numbers<[1], [0], [0], [1], [0, 0, 1, 1], [], []>} : vector<16x4xbf16>, vector<4x8xbf16>, vector<16x8xf32> -> vector<16x8xf32>
    %36 = arith.addf %30, %35 : vector<16x8xf32>
    %c0_42 = arith.constant 0 : index
    %c0_43 = arith.constant 0 : index
    %c0_44 = arith.constant 0 : index
    %c0_45 = arith.constant 0 : index
    %37 = vector.load %arg4[%c0_42, %c0_43, %c0_44, %c0_45] : memref<1x1x18x4xbf16, #tpu.memory_space<vmem>>, vector<1x1x16x4xbf16>
    %38 = vector.shape_cast %37 : vector<1x1x16x4xbf16> to vector<16x4xbf16>
    %c6 = arith.constant 6 : index
    %c0_46 = arith.constant 0 : index
    %c0_47 = arith.constant 0 : index
    %39 = vector.load %arg5[%c6, %c0_46, %c0_47] : memref<9x4x8xbf16, #tpu.memory_space<vmem>>, vector<1x4x8xbf16>
    %40 = vector.shape_cast %39 : vector<1x4x8xbf16> to vector<4x8xbf16>
    %cst_48 = arith.constant dense<0.000000e+00> : vector<16x8xf32>
    %41 = tpu.matmul %38, %40, %cst_48 {dimension_numbers = #tpu.dot_dimension_numbers<[1], [0], [0], [1], [0, 0, 1, 1], [], []>} : vector<16x4xbf16>, vector<4x8xbf16>, vector<16x8xf32> -> vector<16x8xf32>
    %42 = arith.addf %36, %41 : vector<16x8xf32>
    %c0_49 = arith.constant 0 : index
    %c0_50 = arith.constant 0 : index
    %c1_51 = arith.constant 1 : index
    %c0_52 = arith.constant 0 : index
    %43 = vector.load %arg4[%c0_49, %c0_50, %c1_51, %c0_52] : memref<1x1x18x4xbf16, #tpu.memory_space<vmem>>, vector<1x1x16x4xbf16>
    %44 = vector.shape_cast %43 : vector<1x1x16x4xbf16> to vector<16x4xbf16>
    %c7 = arith.constant 7 : index
    %c0_53 = arith.constant 0 : index
    %c0_54 = arith.constant 0 : index
    %45 = vector.load %arg5[%c7, %c0_53, %c0_54] : memref<9x4x8xbf16, #tpu.memory_space<vmem>>, vector<1x4x8xbf16>
    %46 = vector.shape_cast %45 : vector<1x4x8xbf16> to vector<4x8xbf16>
    %cst_55 = arith.constant dense<0.000000e+00> : vector<16x8xf32>
    %47 = tpu.matmul %44, %46, %cst_55 {dimension_numbers = #tpu.dot_dimension_numbers<[1], [0], [0], [1], [0, 0, 1, 1], [], []>} : vector<16x4xbf16>, vector<4x8xbf16>, vector<16x8xf32> -> vector<16x8xf32>
    %48 = arith.addf %42, %47 : vector<16x8xf32>
    %c0_56 = arith.constant 0 : index
    %c0_57 = arith.constant 0 : index
    %c2_58 = arith.constant 2 : index
    %c0_59 = arith.constant 0 : index
    %49 = vector.load %arg4[%c0_56, %c0_57, %c2_58, %c0_59] : memref<1x1x18x4xbf16, #tpu.memory_space<vmem>>, vector<1x1x16x4xbf16>
    %50 = vector.shape_cast %49 : vector<1x1x16x4xbf16> to vector<16x4xbf16>
    %c8 = arith.constant 8 : index
    %c0_60 = arith.constant 0 : index
    %c0_61 = arith.constant 0 : index
    %51 = vector.load %arg5[%c8, %c0_60, %c0_61] : memref<9x4x8xbf16, #tpu.memory_space<vmem>>, vector<1x4x8xbf16>
    %52 = vector.shape_cast %51 : vector<1x4x8xbf16> to vector<4x8xbf16>
    %cst_62 = arith.constant dense<0.000000e+00> : vector<16x8xf32>
    %53 = tpu.matmul %50, %52, %cst_62 {dimension_numbers = #tpu.dot_dimension_numbers<[1], [0], [0], [1], [0, 0, 1, 1], [], []>} : vector<16x4xbf16>, vector<4x8xbf16>, vector<16x8xf32> -> vector<16x8xf32>
    %54 = arith.addf %48, %53 : vector<16x8xf32>
    %c0_63 = arith.constant 0 : index
    %c0_64 = arith.constant 0 : index
    %55 = vector.load %arg6[%c0_63, %c0_64] : memref<1x8xf32, #tpu.memory_space<vmem>>, vector<1x8xf32>
    %56 = vector.broadcast %55 : vector<1x8xf32> to vector<16x8xf32>
    %57 = arith.addf %54, %56 : vector<16x8xf32>
    %c0_65 = arith.constant 0 : index
    %c0_66 = arith.constant 0 : index
    %c0_67 = arith.constant 0 : index
    %c0_68 = arith.constant 0 : index
    %58 = vector.load %arg7[%c0_65, %c0_66, %c0_67, %c0_68] : memref<1x1x16x8xf32, #tpu.memory_space<vmem>>, vector<1x1x16x8xf32>
    %59 = vector.shape_cast %58 : vector<1x1x16x8xf32> to vector<16x8xf32>
    %60 = vector.shape_cast %57 : vector<16x8xf32> to vector<1x1x16x8xf32>
    tpu.vector_store %arg7[%c0_65, %c0_66, %c0_67, %c0_68], %60 {strides = array<i32>} : memref<1x1x16x8xf32, #tpu.memory_space<vmem>>, vector<1x1x16x8xf32>,
    return
  }
  func.func @transform_0(%arg0: i32, %arg1: i32) -> (i32, i32, i32, i32) {
    %c0_i32 = arith.constant 0 : i32
    %0 = arith.addi %arg1, %c0_i32 : i32
    %c0_i32_0 = arith.constant 0 : i32
    %c0_i32_1 = arith.constant 0 : i32
    %c0_i32_2 = arith.constant 0 : i32
    return %arg0, %0, %c0_i32_0, %c0_i32_1 : i32, i32, i32, i32
  }
  func.func @transform_1(%arg0: i32, %arg1: i32) -> (i32, i32, i32, i32) {
    %c1_i32 = arith.constant 1 : i32
    %0 = arith.addi %arg1, %c1_i32 : i32
    %c0_i32 = arith.constant 0 : i32
    %c0_i32_0 = arith.constant 0 : i32
    %c0_i32_1 = arith.constant 0 : i32
    return %arg0, %0, %c0_i32, %c0_i32_0 : i32, i32, i32, i32
  }
  func.func @transform_2(%arg0: i32, %arg1: i32) -> (i32, i32, i32, i32) {
    %c2_i32 = arith.constant 2 : i32
    %0 = arith.addi %arg1, %c2_i32 : i32
    %c0_i32 = arith.constant 0 : i32
    %c0_i32_0 = arith.constant 0 : i32
    %c0_i32_1 = arith.constant 0 : i32
    return %arg0, %0, %c0_i32, %c0_i32_0 : i32, i32, i32, i32
  }
  func.func @transform_3(%arg0: i32, %arg1: i32) -> (i32, i32, i32) {
    %c0_i32 = arith.constant 0 : i32
    %c0_i32_0 = arith.constant 0 : i32
    %c0_i32_1 = arith.constant 0 : i32
    %c0_i32_2 = arith.constant 0 : i32
    return %c0_i32, %c0_i32_0, %c0_i32_1 : i32, i32, i32
  }
  func.func @transform_4(%arg0: i32, %arg1: i32) -> (i32, i32) {
    %c0_i32 = arith.constant 0 : i32
    %c0_i32_0 = arith.constant 0 : i32
    %c0_i32_1 = arith.constant 0 : i32
    return %c0_i32, %c0_i32_0 : i32, i32
  }
  func.func @transform_5(%arg0: i32, %arg1: i32) -> (i32, i32, i32, i32) {
    %c0_i32 = arith.constant 0 : i32
    %c0_i32_0 = arith.constant 0 : i32
    %c0_i32_1 = arith.constant 0 : i32
    return %arg0, %arg1, %c0_i32, %c0_i32_0 : i32, i32, i32, i32
  }
}

module attributes {stable_mosaic.version = 11 : i64} {
  func.func @_affine_relu_kernel(%arg0: i32, %arg1: memref<256x8xf32, #tpu.memory_space<vmem>>, %arg2: memref<1x8xf32, #tpu.memory_space<vmem>>, %arg3: memref<1x8xf32, #tpu.memory_space<vmem>>, %arg4: memref<256x8xbf16, #tpu.memory_space<vmem>>) attributes {dimension_semantics = [#tpu.dimension_semantics<parallel>], iteration_bounds = array<i64: 2>, scalar_prefetch = 0 : i64, scratch_operands = 0 : i64, tpu.core_type = #tpu.core_type<tc>, window_params = [{transform_indices = @transform_0, window_bounds = array<i64: 256, 8>}, {pipeline_mode = #tpu.pipeline_mode<synchronous>, transform_indices = @transform_1, window_bounds = array<i64: 1, 8>}, {pipeline_mode = #tpu.pipeline_mode<synchronous>, transform_indices = @transform_2, window_bounds = array<i64: 1, 8>}, {transform_indices = @transform_3, window_bounds = array<i64: 256, 8>}]} {
    %c0 = arith.constant 0 : index
    %c0_0 = arith.constant 0 : index
    %0 = vector.load %arg1[%c0, %c0_0] : memref<256x8xf32, #tpu.memory_space<vmem>>, vector<256x8xf32>
    %c0_1 = arith.constant 0 : index
    %c0_2 = arith.constant 0 : index
    %1 = vector.load %arg2[%c0_1, %c0_2] : memref<1x8xf32, #tpu.memory_space<vmem>>, vector<1x8xf32>
    %2 = vector.broadcast %1 : vector<1x8xf32> to vector<256x8xf32>
    %3 = arith.mulf %0, %2 : vector<256x8xf32>
    %c0_3 = arith.constant 0 : index
    %c0_4 = arith.constant 0 : index
    %4 = vector.load %arg3[%c0_3, %c0_4] : memref<1x8xf32, #tpu.memory_space<vmem>>, vector<1x8xf32>
    %5 = vector.broadcast %4 : vector<1x8xf32> to vector<256x8xf32>
    %6 = arith.addf %3, %5 : vector<256x8xf32>
    %cst = arith.constant 0.000000e+00 : f32
    %7 = vector.broadcast %cst : f32 to vector<256x8xf32>
    %8 = arith.maximumf %6, %7 : vector<256x8xf32>
    %9 = arith.truncf %8 : vector<256x8xf32> to vector<256x8xbf16>
    %c0_5 = arith.constant 0 : index
    %c0_6 = arith.constant 0 : index
    %10 = vector.load %arg4[%c0_5, %c0_6] : memref<256x8xbf16, #tpu.memory_space<vmem>>, vector<256x8xbf16>
    tpu.vector_store %arg4[%c0_5, %c0_6], %9 {strides = array<i32>} : memref<256x8xbf16, #tpu.memory_space<vmem>>, vector<256x8xbf16>,
    return
  }
  func.func @transform_0(%arg0: i32) -> (i32, i32) {
    %c0_i32 = arith.constant 0 : i32
    %c0_i32_0 = arith.constant 0 : i32
    return %arg0, %c0_i32 : i32, i32
  }
  func.func @transform_1(%arg0: i32) -> (i32, i32) {
    %c0_i32 = arith.constant 0 : i32
    %c0_i32_0 = arith.constant 0 : i32
    %c0_i32_1 = arith.constant 0 : i32
    return %c0_i32, %c0_i32_0 : i32, i32
  }
  func.func @transform_2(%arg0: i32) -> (i32, i32) {
    %c0_i32 = arith.constant 0 : i32
    %c0_i32_0 = arith.constant 0 : i32
    %c0_i32_1 = arith.constant 0 : i32
    return %c0_i32, %c0_i32_0 : i32, i32
  }
  func.func @transform_3(%arg0: i32) -> (i32, i32) {
    %c0_i32 = arith.constant 0 : i32
    %c0_i32_0 = arith.constant 0 : i32
    return %arg0, %c0_i32 : i32, i32
  }
}

module attributes {stable_mosaic.version = 11 : i64} {
  func.func @_conv3x3_row_kernel(%arg0: i32, %arg1: i32, %arg2: memref<1x1x18x8xbf16, #tpu.memory_space<vmem>>, %arg3: memref<1x1x18x8xbf16, #tpu.memory_space<vmem>>, %arg4: memref<1x1x18x8xbf16, #tpu.memory_space<vmem>>, %arg5: memref<9x8x8xbf16, #tpu.memory_space<vmem>>, %arg6: memref<1x8xf32, #tpu.memory_space<vmem>>, %arg7: memref<1x1x16x8xf32, #tpu.memory_space<vmem>>) attributes {dimension_semantics = [#tpu.dimension_semantics<parallel>, #tpu.dimension_semantics<parallel>], iteration_bounds = array<i64: 2, 16>, scalar_prefetch = 0 : i64, scratch_operands = 0 : i64, tpu.core_type = #tpu.core_type<tc>, window_params = [{transform_indices = @transform_0, window_bounds = array<i64: 1, 1, 18, 8>}, {transform_indices = @transform_1, window_bounds = array<i64: 1, 1, 18, 8>}, {transform_indices = @transform_2, window_bounds = array<i64: 1, 1, 18, 8>}, {pipeline_mode = #tpu.pipeline_mode<synchronous>, transform_indices = @transform_3, window_bounds = array<i64: 9, 8, 8>}, {pipeline_mode = #tpu.pipeline_mode<synchronous>, transform_indices = @transform_4, window_bounds = array<i64: 1, 8>}, {transform_indices = @transform_5, window_bounds = array<i64: 1, 1, 16, 8>}]} {
    %cst = arith.constant 0.000000e+00 : f32
    %0 = vector.broadcast %cst : f32 to vector<16x8xf32>
    %c0 = arith.constant 0 : index
    %c0_0 = arith.constant 0 : index
    %c0_1 = arith.constant 0 : index
    %c0_2 = arith.constant 0 : index
    %1 = vector.load %arg2[%c0, %c0_0, %c0_1, %c0_2] : memref<1x1x18x8xbf16, #tpu.memory_space<vmem>>, vector<1x1x16x8xbf16>
    %2 = vector.shape_cast %1 : vector<1x1x16x8xbf16> to vector<16x8xbf16>
    %c0_3 = arith.constant 0 : index
    %c0_4 = arith.constant 0 : index
    %c0_5 = arith.constant 0 : index
    %3 = vector.load %arg5[%c0_3, %c0_4, %c0_5] : memref<9x8x8xbf16, #tpu.memory_space<vmem>>, vector<1x8x8xbf16>
    %4 = vector.shape_cast %3 : vector<1x8x8xbf16> to vector<8x8xbf16>
    %cst_6 = arith.constant dense<0.000000e+00> : vector<16x8xf32>
    %5 = tpu.matmul %2, %4, %cst_6 {dimension_numbers = #tpu.dot_dimension_numbers<[1], [0], [0], [1], [0, 0, 1, 1], [], []>} : vector<16x8xbf16>, vector<8x8xbf16>, vector<16x8xf32> -> vector<16x8xf32>
    %6 = arith.addf %0, %5 : vector<16x8xf32>
    %c0_7 = arith.constant 0 : index
    %c0_8 = arith.constant 0 : index
    %c1 = arith.constant 1 : index
    %c0_9 = arith.constant 0 : index
    %7 = vector.load %arg2[%c0_7, %c0_8, %c1, %c0_9] : memref<1x1x18x8xbf16, #tpu.memory_space<vmem>>, vector<1x1x16x8xbf16>
    %8 = vector.shape_cast %7 : vector<1x1x16x8xbf16> to vector<16x8xbf16>
    %c1_10 = arith.constant 1 : index
    %c0_11 = arith.constant 0 : index
    %c0_12 = arith.constant 0 : index
    %9 = vector.load %arg5[%c1_10, %c0_11, %c0_12] : memref<9x8x8xbf16, #tpu.memory_space<vmem>>, vector<1x8x8xbf16>
    %10 = vector.shape_cast %9 : vector<1x8x8xbf16> to vector<8x8xbf16>
    %cst_13 = arith.constant dense<0.000000e+00> : vector<16x8xf32>
    %11 = tpu.matmul %8, %10, %cst_13 {dimension_numbers = #tpu.dot_dimension_numbers<[1], [0], [0], [1], [0, 0, 1, 1], [], []>} : vector<16x8xbf16>, vector<8x8xbf16>, vector<16x8xf32> -> vector<16x8xf32>
    %12 = arith.addf %6, %11 : vector<16x8xf32>
    %c0_14 = arith.constant 0 : index
    %c0_15 = arith.constant 0 : index
    %c2 = arith.constant 2 : index
    %c0_16 = arith.constant 0 : index
    %13 = vector.load %arg2[%c0_14, %c0_15, %c2, %c0_16] : memref<1x1x18x8xbf16, #tpu.memory_space<vmem>>, vector<1x1x16x8xbf16>
    %14 = vector.shape_cast %13 : vector<1x1x16x8xbf16> to vector<16x8xbf16>
    %c2_17 = arith.constant 2 : index
    %c0_18 = arith.constant 0 : index
    %c0_19 = arith.constant 0 : index
    %15 = vector.load %arg5[%c2_17, %c0_18, %c0_19] : memref<9x8x8xbf16, #tpu.memory_space<vmem>>, vector<1x8x8xbf16>
    %16 = vector.shape_cast %15 : vector<1x8x8xbf16> to vector<8x8xbf16>
    %cst_20 = arith.constant dense<0.000000e+00> : vector<16x8xf32>
    %17 = tpu.matmul %14, %16, %cst_20 {dimension_numbers = #tpu.dot_dimension_numbers<[1], [0], [0], [1], [0, 0, 1, 1], [], []>} : vector<16x8xbf16>, vector<8x8xbf16>, vector<16x8xf32> -> vector<16x8xf32>
    %18 = arith.addf %12, %17 : vector<16x8xf32>
    %c0_21 = arith.constant 0 : index
    %c0_22 = arith.constant 0 : index
    %c0_23 = arith.constant 0 : index
    %c0_24 = arith.constant 0 : index
    %19 = vector.load %arg3[%c0_21, %c0_22, %c0_23, %c0_24] : memref<1x1x18x8xbf16, #tpu.memory_space<vmem>>, vector<1x1x16x8xbf16>
    %20 = vector.shape_cast %19 : vector<1x1x16x8xbf16> to vector<16x8xbf16>
    %c3 = arith.constant 3 : index
    %c0_25 = arith.constant 0 : index
    %c0_26 = arith.constant 0 : index
    %21 = vector.load %arg5[%c3, %c0_25, %c0_26] : memref<9x8x8xbf16, #tpu.memory_space<vmem>>, vector<1x8x8xbf16>
    %22 = vector.shape_cast %21 : vector<1x8x8xbf16> to vector<8x8xbf16>
    %cst_27 = arith.constant dense<0.000000e+00> : vector<16x8xf32>
    %23 = tpu.matmul %20, %22, %cst_27 {dimension_numbers = #tpu.dot_dimension_numbers<[1], [0], [0], [1], [0, 0, 1, 1], [], []>} : vector<16x8xbf16>, vector<8x8xbf16>, vector<16x8xf32> -> vector<16x8xf32>
    %24 = arith.addf %18, %23 : vector<16x8xf32>
    %c0_28 = arith.constant 0 : index
    %c0_29 = arith.constant 0 : index
    %c1_30 = arith.constant 1 : index
    %c0_31 = arith.constant 0 : index
    %25 = vector.load %arg3[%c0_28, %c0_29, %c1_30, %c0_31] : memref<1x1x18x8xbf16, #tpu.memory_space<vmem>>, vector<1x1x16x8xbf16>
    %26 = vector.shape_cast %25 : vector<1x1x16x8xbf16> to vector<16x8xbf16>
    %c4 = arith.constant 4 : index
    %c0_32 = arith.constant 0 : index
    %c0_33 = arith.constant 0 : index
    %27 = vector.load %arg5[%c4, %c0_32, %c0_33] : memref<9x8x8xbf16, #tpu.memory_space<vmem>>, vector<1x8x8xbf16>
    %28 = vector.shape_cast %27 : vector<1x8x8xbf16> to vector<8x8xbf16>
    %cst_34 = arith.constant dense<0.000000e+00> : vector<16x8xf32>
    %29 = tpu.matmul %26, %28, %cst_34 {dimension_numbers = #tpu.dot_dimension_numbers<[1], [0], [0], [1], [0, 0, 1, 1], [], []>} : vector<16x8xbf16>, vector<8x8xbf16>, vector<16x8xf32> -> vector<16x8xf32>
    %30 = arith.addf %24, %29 : vector<16x8xf32>
    %c0_35 = arith.constant 0 : index
    %c0_36 = arith.constant 0 : index
    %c2_37 = arith.constant 2 : index
    %c0_38 = arith.constant 0 : index
    %31 = vector.load %arg3[%c0_35, %c0_36, %c2_37, %c0_38] : memref<1x1x18x8xbf16, #tpu.memory_space<vmem>>, vector<1x1x16x8xbf16>
    %32 = vector.shape_cast %31 : vector<1x1x16x8xbf16> to vector<16x8xbf16>
    %c5 = arith.constant 5 : index
    %c0_39 = arith.constant 0 : index
    %c0_40 = arith.constant 0 : index
    %33 = vector.load %arg5[%c5, %c0_39, %c0_40] : memref<9x8x8xbf16, #tpu.memory_space<vmem>>, vector<1x8x8xbf16>
    %34 = vector.shape_cast %33 : vector<1x8x8xbf16> to vector<8x8xbf16>
    %cst_41 = arith.constant dense<0.000000e+00> : vector<16x8xf32>
    %35 = tpu.matmul %32, %34, %cst_41 {dimension_numbers = #tpu.dot_dimension_numbers<[1], [0], [0], [1], [0, 0, 1, 1], [], []>} : vector<16x8xbf16>, vector<8x8xbf16>, vector<16x8xf32> -> vector<16x8xf32>
    %36 = arith.addf %30, %35 : vector<16x8xf32>
    %c0_42 = arith.constant 0 : index
    %c0_43 = arith.constant 0 : index
    %c0_44 = arith.constant 0 : index
    %c0_45 = arith.constant 0 : index
    %37 = vector.load %arg4[%c0_42, %c0_43, %c0_44, %c0_45] : memref<1x1x18x8xbf16, #tpu.memory_space<vmem>>, vector<1x1x16x8xbf16>
    %38 = vector.shape_cast %37 : vector<1x1x16x8xbf16> to vector<16x8xbf16>
    %c6 = arith.constant 6 : index
    %c0_46 = arith.constant 0 : index
    %c0_47 = arith.constant 0 : index
    %39 = vector.load %arg5[%c6, %c0_46, %c0_47] : memref<9x8x8xbf16, #tpu.memory_space<vmem>>, vector<1x8x8xbf16>
    %40 = vector.shape_cast %39 : vector<1x8x8xbf16> to vector<8x8xbf16>
    %cst_48 = arith.constant dense<0.000000e+00> : vector<16x8xf32>
    %41 = tpu.matmul %38, %40, %cst_48 {dimension_numbers = #tpu.dot_dimension_numbers<[1], [0], [0], [1], [0, 0, 1, 1], [], []>} : vector<16x8xbf16>, vector<8x8xbf16>, vector<16x8xf32> -> vector<16x8xf32>
    %42 = arith.addf %36, %41 : vector<16x8xf32>
    %c0_49 = arith.constant 0 : index
    %c0_50 = arith.constant 0 : index
    %c1_51 = arith.constant 1 : index
    %c0_52 = arith.constant 0 : index
    %43 = vector.load %arg4[%c0_49, %c0_50, %c1_51, %c0_52] : memref<1x1x18x8xbf16, #tpu.memory_space<vmem>>, vector<1x1x16x8xbf16>
    %44 = vector.shape_cast %43 : vector<1x1x16x8xbf16> to vector<16x8xbf16>
    %c7 = arith.constant 7 : index
    %c0_53 = arith.constant 0 : index
    %c0_54 = arith.constant 0 : index
    %45 = vector.load %arg5[%c7, %c0_53, %c0_54] : memref<9x8x8xbf16, #tpu.memory_space<vmem>>, vector<1x8x8xbf16>
    %46 = vector.shape_cast %45 : vector<1x8x8xbf16> to vector<8x8xbf16>
    %cst_55 = arith.constant dense<0.000000e+00> : vector<16x8xf32>
    %47 = tpu.matmul %44, %46, %cst_55 {dimension_numbers = #tpu.dot_dimension_numbers<[1], [0], [0], [1], [0, 0, 1, 1], [], []>} : vector<16x8xbf16>, vector<8x8xbf16>, vector<16x8xf32> -> vector<16x8xf32>
    %48 = arith.addf %42, %47 : vector<16x8xf32>
    %c0_56 = arith.constant 0 : index
    %c0_57 = arith.constant 0 : index
    %c2_58 = arith.constant 2 : index
    %c0_59 = arith.constant 0 : index
    %49 = vector.load %arg4[%c0_56, %c0_57, %c2_58, %c0_59] : memref<1x1x18x8xbf16, #tpu.memory_space<vmem>>, vector<1x1x16x8xbf16>
    %50 = vector.shape_cast %49 : vector<1x1x16x8xbf16> to vector<16x8xbf16>
    %c8 = arith.constant 8 : index
    %c0_60 = arith.constant 0 : index
    %c0_61 = arith.constant 0 : index
    %51 = vector.load %arg5[%c8, %c0_60, %c0_61] : memref<9x8x8xbf16, #tpu.memory_space<vmem>>, vector<1x8x8xbf16>
    %52 = vector.shape_cast %51 : vector<1x8x8xbf16> to vector<8x8xbf16>
    %cst_62 = arith.constant dense<0.000000e+00> : vector<16x8xf32>
    %53 = tpu.matmul %50, %52, %cst_62 {dimension_numbers = #tpu.dot_dimension_numbers<[1], [0], [0], [1], [0, 0, 1, 1], [], []>} : vector<16x8xbf16>, vector<8x8xbf16>, vector<16x8xf32> -> vector<16x8xf32>
    %54 = arith.addf %48, %53 : vector<16x8xf32>
    %c0_63 = arith.constant 0 : index
    %c0_64 = arith.constant 0 : index
    %55 = vector.load %arg6[%c0_63, %c0_64] : memref<1x8xf32, #tpu.memory_space<vmem>>, vector<1x8xf32>
    %56 = vector.broadcast %55 : vector<1x8xf32> to vector<16x8xf32>
    %57 = arith.addf %54, %56 : vector<16x8xf32>
    %c0_65 = arith.constant 0 : index
    %c0_66 = arith.constant 0 : index
    %c0_67 = arith.constant 0 : index
    %c0_68 = arith.constant 0 : index
    %58 = vector.load %arg7[%c0_65, %c0_66, %c0_67, %c0_68] : memref<1x1x16x8xf32, #tpu.memory_space<vmem>>, vector<1x1x16x8xf32>
    %59 = vector.shape_cast %58 : vector<1x1x16x8xf32> to vector<16x8xf32>
    %60 = vector.shape_cast %57 : vector<16x8xf32> to vector<1x1x16x8xf32>
    tpu.vector_store %arg7[%c0_65, %c0_66, %c0_67, %c0_68], %60 {strides = array<i32>} : memref<1x1x16x8xf32, #tpu.memory_space<vmem>>, vector<1x1x16x8xf32>,
    return
  }
  func.func @transform_0(%arg0: i32, %arg1: i32) -> (i32, i32, i32, i32) {
    %c0_i32 = arith.constant 0 : i32
    %0 = arith.addi %arg1, %c0_i32 : i32
    %c0_i32_0 = arith.constant 0 : i32
    %c0_i32_1 = arith.constant 0 : i32
    %c0_i32_2 = arith.constant 0 : i32
    return %arg0, %0, %c0_i32_0, %c0_i32_1 : i32, i32, i32, i32
  }
  func.func @transform_1(%arg0: i32, %arg1: i32) -> (i32, i32, i32, i32) {
    %c1_i32 = arith.constant 1 : i32
    %0 = arith.addi %arg1, %c1_i32 : i32
    %c0_i32 = arith.constant 0 : i32
    %c0_i32_0 = arith.constant 0 : i32
    %c0_i32_1 = arith.constant 0 : i32
    return %arg0, %0, %c0_i32, %c0_i32_0 : i32, i32, i32, i32
  }
  func.func @transform_2(%arg0: i32, %arg1: i32) -> (i32, i32, i32, i32) {
    %c2_i32 = arith.constant 2 : i32
    %0 = arith.addi %arg1, %c2_i32 : i32
    %c0_i32 = arith.constant 0 : i32
    %c0_i32_0 = arith.constant 0 : i32
    %c0_i32_1 = arith.constant 0 : i32
    return %arg0, %0, %c0_i32, %c0_i32_0 : i32, i32, i32, i32
  }
  func.func @transform_3(%arg0: i32, %arg1: i32) -> (i32, i32, i32) {
    %c0_i32 = arith.constant 0 : i32
    %c0_i32_0 = arith.constant 0 : i32
    %c0_i32_1 = arith.constant 0 : i32
    %c0_i32_2 = arith.constant 0 : i32
    return %c0_i32, %c0_i32_0, %c0_i32_1 : i32, i32, i32
  }
  func.func @transform_4(%arg0: i32, %arg1: i32) -> (i32, i32) {
    %c0_i32 = arith.constant 0 : i32
    %c0_i32_0 = arith.constant 0 : i32
    %c0_i32_1 = arith.constant 0 : i32
    return %c0_i32, %c0_i32_0 : i32, i32
  }
  func.func @transform_5(%arg0: i32, %arg1: i32) -> (i32, i32, i32, i32) {
    %c0_i32 = arith.constant 0 : i32
    %c0_i32_0 = arith.constant 0 : i32
    %c0_i32_1 = arith.constant 0 : i32
    return %arg0, %arg1, %c0_i32, %c0_i32_0 : i32, i32, i32, i32
  }
}

module attributes {stable_mosaic.version = 11 : i64} {
  func.func @_affine_relu_kernel(%arg0: i32, %arg1: memref<256x8xf32, #tpu.memory_space<vmem>>, %arg2: memref<1x8xf32, #tpu.memory_space<vmem>>, %arg3: memref<1x8xf32, #tpu.memory_space<vmem>>, %arg4: memref<256x8xf32, #tpu.memory_space<vmem>>) attributes {dimension_semantics = [#tpu.dimension_semantics<parallel>], iteration_bounds = array<i64: 2>, scalar_prefetch = 0 : i64, scratch_operands = 0 : i64, tpu.core_type = #tpu.core_type<tc>, window_params = [{transform_indices = @transform_0, window_bounds = array<i64: 256, 8>}, {pipeline_mode = #tpu.pipeline_mode<synchronous>, transform_indices = @transform_1, window_bounds = array<i64: 1, 8>}, {pipeline_mode = #tpu.pipeline_mode<synchronous>, transform_indices = @transform_2, window_bounds = array<i64: 1, 8>}, {transform_indices = @transform_3, window_bounds = array<i64: 256, 8>}]} {
    %c0 = arith.constant 0 : index
    %c0_0 = arith.constant 0 : index
    %0 = vector.load %arg1[%c0, %c0_0] : memref<256x8xf32, #tpu.memory_space<vmem>>, vector<256x8xf32>
    %c0_1 = arith.constant 0 : index
    %c0_2 = arith.constant 0 : index
    %1 = vector.load %arg2[%c0_1, %c0_2] : memref<1x8xf32, #tpu.memory_space<vmem>>, vector<1x8xf32>
    %2 = vector.broadcast %1 : vector<1x8xf32> to vector<256x8xf32>
    %3 = arith.mulf %0, %2 : vector<256x8xf32>
    %c0_3 = arith.constant 0 : index
    %c0_4 = arith.constant 0 : index
    %4 = vector.load %arg3[%c0_3, %c0_4] : memref<1x8xf32, #tpu.memory_space<vmem>>, vector<1x8xf32>
    %5 = vector.broadcast %4 : vector<1x8xf32> to vector<256x8xf32>
    %6 = arith.addf %3, %5 : vector<256x8xf32>
    %cst = arith.constant 0.000000e+00 : f32
    %7 = vector.broadcast %cst : f32 to vector<256x8xf32>
    %8 = arith.maximumf %6, %7 : vector<256x8xf32>
    %c0_5 = arith.constant 0 : index
    %c0_6 = arith.constant 0 : index
    %9 = vector.load %arg4[%c0_5, %c0_6] : memref<256x8xf32, #tpu.memory_space<vmem>>, vector<256x8xf32>
    tpu.vector_store %arg4[%c0_5, %c0_6], %8 {strides = array<i32>} : memref<256x8xf32, #tpu.memory_space<vmem>>, vector<256x8xf32>,
    return
  }
  func.func @transform_0(%arg0: i32) -> (i32, i32) {
    %c0_i32 = arith.constant 0 : i32
    %c0_i32_0 = arith.constant 0 : i32
    return %arg0, %c0_i32 : i32, i32
  }
  func.func @transform_1(%arg0: i32) -> (i32, i32) {
    %c0_i32 = arith.constant 0 : i32
    %c0_i32_0 = arith.constant 0 : i32
    %c0_i32_1 = arith.constant 0 : i32
    return %c0_i32, %c0_i32_0 : i32, i32
  }
  func.func @transform_2(%arg0: i32) -> (i32, i32) {
    %c0_i32 = arith.constant 0 : i32
    %c0_i32_0 = arith.constant 0 : i32
    %c0_i32_1 = arith.constant 0 : i32
    return %c0_i32, %c0_i32_0 : i32, i32
  }
  func.func @transform_3(%arg0: i32) -> (i32, i32) {
    %c0_i32 = arith.constant 0 : i32
    %c0_i32_0 = arith.constant 0 : i32
    return %arg0, %c0_i32 : i32, i32
  }
}

</mosaic_0001>

<bundles_post_ra>
// kernel: conv_block_forward.7
= control target key start
LH: loop header
LB: loop body
LE: loop exit
PB: predicated region body
PF: predicated region fallthrough
CT: control target
= control target key end

     0   :  { %s422_s9 = smov 0   ;;  %s554_s0 = inlined_call_operand.vmem [shape: f32[512,8], index: 0, kind: input, shape index: {}]   ;;  %s555_s1 = inlined_call_operand.vmem [shape: f32[1,8], index: 1, kind: output, shape index: {0}]   ;;  %s556_s2 = inlined_call_operand.vmem [shape: f32[1,8], index: 2, kind: output, shape index: {1}]  }
   0x1 LB: > { %s380_s10 = sadd.s32 4294967295, %s404_s9   ;;  %p383_p0 = scmp.ge.s32.totalorder %s404_s9, 1  ;;  %s404_s9 = sphi %s422_s9, %s13_s9  }
   0x2   : > { %p106_p1 = scmp.lt.s32.totalorder %s404_s9, 3 }
   0x4   : > { %p107_p2 = pnand %p383_p0, %p106_p1 }
   0x5   : > { %s384_s11 = sshll.u32 (!%p107_p2), %s380_s10, 5  ;;  %p386_p4 = scmp.ne.s32.totalorder (!%p107_p2), %s380_s10, 0 }
   0x6   : > { %110 = sbr.rel (%p107_p2) target bundleno = 104 (0x68), region = 24  ;;  %p124_p3 = scmp.lt.s32.totalorder (!%p107_p2), %s384_s11, 63 }
   0xd   : > { %s558_s11 = smov (!%p124_p3, %s384_s11), 63  ;;  %132 = sbr.rel (%p386_p4) target bundleno = 20 (0x14), region = 28 }
   0xe   : > { %s385_s12 = sshll.u32 %s558_s11, 3  ;;  %vm133_vm0 = vcmask (!%p386_p4), 57344   ;;  %v406_v0 = vmov (!%p386_p4), 0.0  }
   0xf   : > { %s433_s15 = scalar_lea.vmem %s554_s0, %s385_s12  ;;  %134 = vst.msk [vmem:[%s555_s1] sm:$0x1] (!%p386_p4), %vm133_vm0, %v406_v0  ;;  %135 = vst.msk [vmem:[%s556_s2] sm:$0x1] (!%p386_p4), %vm133_vm0, %v406_v0 }
  0x14 PF: > { %v136_v1 = vld [vmem:[%s433_s15] sm:$0xff]  ;;  %v137_v2 = vld [vmem:[%s433_s15 + $0x8] sm:$0xff]  ;;  %v138_v3 = vld [vmem:[%s433_s15 + $0x10] sm:$0xff]  ;;  %vm169_vm1 = vcmask 64512   ;;  %vm240_vm2 = vcmask 57344  }
  0x15   : > { %v170_v4 = vsel %vm169_vm1, %v136_v1, 0.0  ;;  %v171_v5 = vsel %vm169_vm1, %v137_v2, 0.0  ;;  %v173_v6 = vsel %vm169_vm1, %v138_v3, 0.0  ;;  %v139_v7 = vld [vmem:[%s433_s15 + $0x18] sm:$0xff]  ;;  %v140_v10 = vld [vmem:[%s433_s15 + $0x20] sm:$0xff]  ;;  %v141_v13 = vld [vmem:[%s433_s15 + $0x28] sm:$0xff]  ;;  %v243_v28 = vmul.f32 %v136_v1, %v136_v1 }
  0x16   : > { %v172_v8 = vadd.f32 %v171_v5, %v170_v4  ;;  %v175_v9 = vsel %vm169_vm1, %v139_v7, 0.0  ;;  %v177_v12 = vsel %vm169_vm1, %v140_v10, 0.0  ;;  %v179_v15 = vsel %vm169_vm1, %v141_v13, 0.0  ;;  %v142_v16 = vld [vmem:[%s433_s15 + $0x30] sm:$0xff]  ;;  %v143_v19 = vld [vmem:[%s433_s15 + $0x38] sm:$0xff]  ;;  %v144_v22 = vld [vmem:[%s433_s15 + $0x40] sm:$0xff] }
  0x17   : > { %v181_v18 = vsel %vm169_vm1, %v142_v16, 0.0  ;;  %v183_v21 = vsel %vm169_vm1, %v143_v19, 0.0  ;;  %v185_v24 = vsel %vm169_vm1, %v144_v22, 0.0  ;;  %v145_v25 = vld [vmem:[%s433_s15 + $0x48] sm:$0xff]  ;;  %v244_v29 = vmul.f32 %v137_v2, %v137_v2  ;;  %v146_v31 = vld [vmem:[%s433_s15 + $0x50] sm:$0xff]  ;;  %v147_v33 = vld [vmem:[%s433_s15 + $0x58] sm:$0xff] }
  0x18   : > { %v174_v11 = vadd.f32 %v173_v6, %v172_v8  ;;  %v187_v27 = vsel %vm169_vm1, %v145_v25, 0.0  ;;  %v245_v30 = vmul.f32 %v138_v3, %v138_v3  ;;  %v189_v34 = vsel %vm169_vm1, %v146_v31, 0.0  ;;  %v148_v42 = vld [vmem:[%s433_s15 + $0x60] sm:$0xff]  ;;  %v149_v48 = vld [vmem:[%s433_s15 + $0x68] sm:$0xff]  ;;  %v150_v54 = vld [vmem:[%s433_s15 + $0x70] sm:$0xff] }
  0x19   : > { %v246_v35 = vmul.f32 %v139_v7, %v139_v7  ;;  %v191_v37 = vsel %vm169_vm1, %v147_v33, 0.0  ;;  %v247_v38 = vmul.f32 %v140_v10, %v140_v10  ;;  %v275_v39 = vsel %vm169_vm1, %v243_v28, 0.0  ;;  %v151_v60 = vld [vmem:[%s433_s15 + $0x78] sm:$0xff]  ;;  %v152_v2 = vld [vmem:[%s433_s15 + $0x80] sm:$0xff]  ;;  %v153_v8 = vld [vmem:[%s433_s15 + $0x88] sm:$0xff] }
  0x1a   : > { %v176_v14 = vadd.f32 %v175_v9, %v174_v11  ;;  %v276_v40 = vsel %vm169_vm1, %v244_v29, 0.0  ;;  %v278_v41 = vsel %vm169_vm1, %v245_v30, 0.0  ;;  %v193_v45 = vsel %vm169_vm1, %v148_v42, 0.0 }
  0x1b   : > { %v277_v44 = vadd.f32 %v276_v40, %v275_v39  ;;  %v248_v46 = vmul.f32 %v141_v13, %v141_v13  ;;  %v280_v47 = vsel %vm169_vm1, %v246_v35, 0.0  ;;  %v195_v51 = vsel %vm169_vm1, %v149_v48, 0.0 }
  0x1c   : > { %v178_v17 = vadd.f32 %v177_v12, %v176_v14  ;;  %v249_v52 = vmul.f32 %v142_v16, %v142_v16  ;;  %v282_v53 = vsel %vm169_vm1, %v247_v38, 0.0  ;;  %v197_v57 = vsel %vm169_vm1, %v150_v54, 0.0  ;;  %v154_v14 = vld [vmem:[%s433_s15 + $0x90] sm:$0xff] }
  0x1d   : > { %v279_v50 = vadd.f32 %v278_v41, %v277_v44  ;;  %v250_v58 = vmul.f32 %v143_v19, %v143_v19  ;;  %v284_v59 = vsel %vm169_vm1, %v248_v46, 0.0  ;;  %v199_v63 = vsel %vm169_vm1, %v151_v60, 0.0  ;;  %v158_v38 = vld [vmem:[%s433_s15 + $0xb0] sm:$0xff]  ;;  %v159_v44 = vld [vmem:[%s433_s15 + $0xb8] sm:$0xff] }
  0x1e   : > { %v180_v20 = vadd.f32 %v179_v15, %v178_v17  ;;  %v251_v0 = vmul.f32 %v144_v22, %v144_v22  ;;  %v286_v1 = vsel %vm169_vm1, %v249_v52, 0.0  ;;  %v201_v5 = vsel %vm169_vm1, %v152_v2, 0.0 }
  0x1f   : > { %v281_v56 = vadd.f32 %v280_v47, %v279_v50  ;;  %v252_v6 = vmul.f32 %v145_v25, %v145_v25  ;;  %v288_v7 = vsel %vm169_vm1, %v250_v58, 0.0  ;;  %v203_v11 = vsel %vm169_vm1, %v153_v8, 0.0  ;;  %v160_v50 = vld [vmem:[%s433_s15 + $0xc0] sm:$0xff] }
  0x20   : > { %v182_v23 = vadd.f32 %v181_v18, %v180_v20  ;;  %v253_v12 = vmul.f32 %v146_v31, %v146_v31  ;;  %v290_v13 = vsel %vm169_vm1, %v251_v0, 0.0  ;;  %v205_v17 = vsel %vm169_vm1, %v154_v14, 0.0  ;;  %v155_v20 = vld [vmem:[%s433_s15 + $0x98] sm:$0xff] }
  0x21   : > { %v283_v62 = vadd.f32 %v282_v53, %v281_v56  ;;  %v254_v18 = vmul.f32 %v147_v33, %v147_v33  ;;  %v292_v19 = vsel %vm169_vm1, %v252_v6, 0.0  ;;  %v256_v30 = vmul.f32 %v149_v48, %v149_v48  ;;  %v161_v56 = vld [vmem:[%s433_s15 + $0xc8] sm:$0xff] }
  0x22   : > { %v184_v26 = vadd.f32 %v183_v21, %v182_v23  ;;  %v207_v23 = vsel %vm169_vm1, %v155_v20, 0.0  ;;  %v294_v25 = vsel %vm169_vm1, %v253_v12, 0.0  ;;  %v213_v41 = vsel %vm169_vm1, %v158_v38, 0.0 }
  0x23   : > { %v285_v4 = vadd.f32 %v284_v59, %v283_v62  ;;  %v296_v31 = vsel %vm169_vm1, %v254_v18, 0.0  ;;  %v215_v47 = vsel %vm169_vm1, %v159_v44, 0.0  ;;  %v259_v48 = vmul.f32 %v152_v2, %v152_v2  ;;  %v162_v62 = vld [vmem:[%s433_s15 + $0xd0] sm:$0xff] }
  0x24   : > { %v186_v32 = vadd.f32 %v185_v24, %v184_v26  ;;  %v255_v24 = vmul.f32 %v148_v42, %v148_v42  ;;  %v156_v26 = vld [vmem:[%s433_s15 + $0xa0] sm:$0xff]  ;;  %v258_v42 = vmul.f32 %v151_v60, %v151_v60  ;;  %v217_v53 = vsel %vm169_vm1, %v160_v50, 0.0 }
  0x25   : > { %v287_v10 = vadd.f32 %v286_v1, %v285_v4  ;;  %v209_v29 = vsel %vm169_vm1, %v156_v26, 0.0  ;;  %v219_v59 = vsel %vm169_vm1, %v161_v56, 0.0  ;;  %v261_v60 = vmul.f32 %v154_v14, %v154_v14  ;;  %v163_v4 = vld [vmem:[%s433_s15 + $0xd8] sm:$0xff] }
  0x26   : > { %v188_v36 = vadd.f32 %v187_v27, %v186_v32  ;;  %v157_v32 = vld [vmem:[%s433_s15 + $0xa8] sm:$0xff]  ;;  %v221_v1 = vsel %vm169_vm1, %v162_v62, 0.0  ;;  %v262_v2 = vmul.f32 %v155_v20, %v155_v20  ;;  %v265_v20 = vmul.f32 %v158_v38, %v158_v38 }
  0x27   : > { %v289_v16 = vadd.f32 %v288_v7, %v287_v10  ;;  %v211_v35 = vsel %vm169_vm1, %v157_v32, 0.0  ;;  %v223_v7 = vsel %vm169_vm1, %v163_v4, 0.0  ;;  %v164_v10 = vld [vmem:[%s433_s15 + $0xe0] sm:$0xff]  ;;  %v264_v14 = vmul.f32 %v157_v32, %v157_v32 }
  0x28   : > { %v190_v43 = vadd.f32 %v189_v34, %v188_v36  ;;  %v257_v36 = vmul.f32 %v150_v54, %v150_v54  ;;  %v260_v54 = vmul.f32 %v153_v8, %v153_v8  ;;  %v263_v8 = vmul.f32 %v156_v26, %v156_v26 }
  0x29   : > { %v291_v22 = vadd.f32 %v290_v13, %v289_v16  ;;  %v225_v13 = vsel %vm169_vm1, %v164_v10, 0.0  ;;  %v165_v16 = vld [vmem:[%s433_s15 + $0xe8] sm:$0xff]  ;;  %v266_v26 = vmul.f32 %v159_v44, %v159_v44  ;;  %v267_v32 = vmul.f32 %v160_v50, %v160_v50 }
  0x2a   : > { %v192_v49 = vadd.f32 %v191_v37, %v190_v43  ;;  %v298_v37 = vsel %vm169_vm1, %v255_v24, 0.0  ;;  %v300_v43 = vsel %vm169_vm1, %v256_v30, 0.0  ;;  %v270_v44 = vmul.f32 %v163_v4, %v163_v4 }
  0x2b   : > { %v293_v28 = vadd.f32 %v292_v19, %v291_v22  ;;  %v227_v19 = vsel %vm169_vm1, %v165_v16, 0.0  ;;  %v166_v22 = vld [vmem:[%s433_s15 + $0xf0] sm:$0xff] }
  0x2c   : > { %v194_v55 = vadd.f32 %v193_v45, %v192_v49  ;;  %v302_v49 = vsel %vm169_vm1, %v257_v36, 0.0  ;;  %v268_v36 = vmul.f32 %v161_v56, %v161_v56  ;;  %v273_v56 = vmul.f32 %v166_v22, %v166_v22 }
  0x2d   : > { %v295_v34 = vadd.f32 %v294_v25, %v293_v28  ;;  %v229_v25 = vsel %vm169_vm1, %v166_v22, 0.0  ;;  %v167_v28 = vld [vmem:[%s433_s15 + $0xf8] sm:$0xff] }
  0x2e   : > { %v196_v61 = vadd.f32 %v195_v51, %v194_v55  ;;  %v304_v55 = vsel %vm169_vm1, %v258_v42, 0.0 }
  0x2f   : > { %v297_v40 = vadd.f32 %v296_v31, %v295_v34  ;;  %v231_v31 = vsel %vm169_vm1, %v167_v28, 0.0 }
  0x30   : > { %v198_v3 = vadd.f32 %v197_v57, %v196_v61  ;;  %v306_v61 = vsel %vm169_vm1, %v259_v48, 0.0  ;;  %v271_v48 = vmul.f32 %v164_v10, %v164_v10 }
  0x31   : > { %v299_v46 = vadd.f32 %v298_v37, %v297_v40  ;;  %v320_v37 = vsel %vm169_vm1, %v266_v26, 0.0  ;;  %v269_v40 = vmul.f32 %v162_v62, %v162_v62 }
  0x32   : > { %v200_v9 = vadd.f32 %v199_v63, %v198_v3  ;;  %v308_v3 = vsel %vm169_vm1, %v260_v54, 0.0 }
  0x33   : > { %v301_v52 = vadd.f32 %v300_v43, %v299_v46 }
  0x34   : > { %v202_v15 = vadd.f32 %v201_v5, %v200_v9  ;;  %v310_v9 = vsel %vm169_vm1, %v261_v60, 0.0  ;;  %v168_v60 = vld [vmem:[%s555_s1] sm:$0x1] }
  0x35   : > { %v303_v58 = vadd.f32 %v302_v49, %v301_v52  ;;  %v326_v49 = vsel %vm169_vm1, %v269_v40, 0.0  ;;  %v272_v52 = vmul.f32 %v165_v16, %v165_v16 }
  0x36   : > { %v204_v21 = vadd.f32 %v203_v11, %v202_v15  ;;  %v312_v15 = vsel %vm169_vm1, %v262_v2, 0.0 }
  0x37   : > { %v305_v0 = vadd.f32 %v304_v55, %v303_v58  ;;  %v332_v62 = vsel %vm169_vm1, %v272_v52, 0.0 }
  0x38   : > { %v206_v27 = vadd.f32 %v205_v17, %v204_v21  ;;  %v314_v21 = vsel %vm169_vm1, %v263_v8, 0.0 }
  0x39   : > { %v307_v6 = vadd.f32 %v306_v61, %v305_v0  ;;  %v274_v61 = vmul.f32 %v167_v28, %v167_v28 }
  0x3a   : > { %v208_v33 = vadd.f32 %v207_v23, %v206_v27  ;;  %v316_v27 = vsel %vm169_vm1, %v264_v14, 0.0 }
  0x3b   : > { %v309_v12 = vadd.f32 %v308_v3, %v307_v6  ;;  %v336_v4 = vsel %vm169_vm1, %v274_v61, 0.0 }
  0x3c   : > { %v210_v39 = vadd.f32 %v209_v29, %v208_v33  ;;  %v318_v33 = vsel %vm169_vm1, %v265_v20, 0.0 }
  0x3d   : > { %v311_v18 = vadd.f32 %v310_v9, %v309_v12  ;;  %v242_v12 = vld [vmem:[%s556_s2] sm:$0x1] }
  0x3e   : > { %v212_v45 = vadd.f32 %v211_v35, %v210_v39 }
  0x3f   : > { %v313_v24 = vadd.f32 %v312_v15, %v311_v18 }
  0x40   : > { %v214_v51 = vadd.f32 %v213_v41, %v212_v45  ;;  %v322_v41 = vsel %vm169_vm1, %v267_v32, 0.0  ;;  %v324_v45 = vsel %vm169_vm1, %v268_v36, 0.0 }
  0x41   : > { %v315_v30 = vadd.f32 %v314_v21, %v313_v24 }
  0x42   : > { %v216_v57 = vadd.f32 %v215_v47, %v214_v51 }
  0x43   : > { %v317_v35 = vadd.f32 %v316_v27, %v315_v30 }
  0x44   : > { %v218_v63 = vadd.f32 %v217_v53, %v216_v57  ;;  %v328_v53 = vsel %vm169_vm1, %v270_v44, 0.0  ;;  %v330_v57 = vsel %vm169_vm1, %v271_v48, 0.0 }
  0x45   : > { %v319_v39 = vadd.f32 %v318_v33, %v317_v35 }
  0x46   : > { %v220_v5 = vadd.f32 %v219_v59, %v218_v63 }
  0x47   : > { %v321_v43 = vadd.f32 %v320_v37, %v319_v39 }
  0x48   : > { %v222_v11 = vadd.f32 %v221_v1, %v220_v5  ;;  %v334_v1 = vsel %vm169_vm1, %v273_v56, 0.0 }
  0x49   : > { %v323_v47 = vadd.f32 %v322_v41, %v321_v43 }
  0x4a   : > { %v224_v17 = vadd.f32 %v223_v7, %v222_v11 }
  0x4b   : > { %v325_v51 = vadd.f32 %v324_v45, %v323_v47 }
  0x4c   : > { %v226_v23 = vadd.f32 %v225_v13, %v224_v17 }
  0x4d   : > { %v327_v55 = vadd.f32 %v326_v49, %v325_v51 }
  0x4e   : > { %v228_v29 = vadd.f32 %v227_v19, %v226_v23 }
  0x4f   : > { %v329_v59 = vadd.f32 %v328_v53, %v327_v55 }
  0x50   : > { %v230_v34 = vadd.f32 %v229_v25, %v228_v29 }
  0x51   : > { %v331_v0 = vadd.f32 %v330_v57, %v329_v59 }
  0x52   : > { %v232_v38 = vadd.f32 %v231_v31, %v230_v34 }
  0x53   : > { %v333_v3 = vadd.f32 %v332_v62, %v331_v0 }
  0x54   : > { %v233_v42 = vrot.slane %v232_v38, 4 }
  0x55   : > { %v335_v5 = vadd.f32 %v334_v1, %v333_v3 }
  0x56   : > { %v234_v46 = vadd.f32 %v233_v42, %v232_v38 }
  0x57   : > { %v337_v6 = vadd.f32 %v336_v4, %v335_v5 }
  0x58   : > { %v235_v50 = vrot.slane %v234_v46, 2 }
  0x59   : > { %v338_v7 = vrot.slane %v337_v6, 4 }
  0x5a   : > { %v236_v54 = vadd.f32 %v235_v50, %v234_v46 }
  0x5b   : > { %v339_v8 = vadd.f32 %v338_v7, %v337_v6 }
  0x5c   : > { %v237_v58 = vrot.slane %v236_v54, 1 }
  0x5d   : > { %v340_v9 = vrot.slane %v339_v8, 2 }
  0x5e   : > { %v238_v63 = vadd.f32 %v237_v58, %v236_v54 }
  0x5f   : > { %v341_v10 = vadd.f32 %v340_v9, %v339_v8 }
  0x60   : > { %v239_v2 = vadd.f32 %v238_v63, %v168_v60 }
  0x61   : > { %v342_v11 = vrot.slane %v341_v10, 1 }
  0x62   : > { %241 = vst.msk [vmem:[%s555_s1] sm:$0x1] %vm240_vm2, %v239_v2 }
  0x63   : > { %v343_v13 = vadd.f32 %v342_v11, %v341_v10 }
  0x65   : > { %v344_v14 = vadd.f32 %v343_v13, %v242_v12 }
  0x67   : > { %345 = vst.msk [vmem:[%s556_s2] sm:$0x1] %vm240_vm2, %v344_v14 }
  0x68 PF: > { %s13_s9 = sadd.s32 1, %s404_s9  }
  0x69   : > { %p10_p5 = scmp.ge.s32.totalorder %s13_s9, 4  }
  0x6b   :  { %12 = sbr.rel (!%p10_p5) target bundleno = 1 (0x1), region = 62 }

// kernel: conv_block_forward.8
= control target key start
LH: loop header
LB: loop body
LE: loop exit
PB: predicated region body
PF: predicated region fallthrough
CT: control target
= control target key end

     0   :  { %s646_s12 = smov 0   ;;  %s841_s0 = inlined_call_operand.vmem [shape: f32[512,8], index: 0, kind: input, shape index: {}]   ;;  %s842_s1 = inlined_call_operand.vmem [shape: f32[1,8], index: 1, kind: input, shape index: {}]   ;;  %s843_s2 = inlined_call_operand.vmem [shape: f32[1,8], index: 2, kind: input, shape index: {}]   ;;  %s844_s3 = inlined_call_operand.vmem [shape: bf16[512,8], index: 3, kind: output, shape index: {}]  }
   0x1 LB: > { %s533_s13 = sadd.s32 4294967295, %s624_s12   ;;  %p537_p0 = scmp.ge.s32.totalorder %s624_s12, 1  ;;  %s624_s12 = sphi %s646_s12, %s13_s12  }
   0x2   : > { %p138_p1 = scmp.lt.s32.totalorder %s624_s12, 3 }
   0x4   : > { %p139_p2 = pnand %p537_p0, %p138_p1 }
   0x5   : > { %s538_s14 = sshll.u32 (!%p139_p2), %s533_s13, 5  ;;  %v660_v0 = vld [vmem:[%s842_s1] ss:$0 sm:$0xff] (!%p139_p2)  ;;  %vm444_vm0 = vcmask (!%p139_p2), 60416  }
   0x6   : > { %142 = sbr.rel (%p139_p2) target bundleno = 56 (0x38), region = 32  ;;  %p163_p3 = scmp.lt.s32.totalorder (!%p139_p2), %s538_s14, 63  ;;  %v670_v1 = vld [vmem:[%s843_s2] ss:$0 sm:$0xff] (!%p139_p2) }
   0xd   : > { %s846_s14 = smov (!%p163_p3, %s538_s14), 63 }
   0xe   : > { %s539_s15 = sshll.u32 %s846_s14, 3  ;;  %s541_s23 = sshll.u32 %s846_s14, 2 }
   0xf   : > { %s665_s20 = scalar_lea.vmem %s841_s0, %s539_s15  ;;  %s699_s26 = scalar_lea.vmem %s844_s3, %s541_s23 }
  0x10   : > { %v174_v2 = vld [vmem:[%s665_s20] sm:$0xff]  ;;  %v175_v3 = vld [vmem:[%s665_s20 + $0x8] sm:$0xff]  ;;  %v176_v4 = vld [vmem:[%s665_s20 + $0x10] sm:$0xff] }
  0x11   : > { %v213_v5 = vmul.f32 %v660_v0, %v174_v2  ;;  %v214_v6 = vmul.f32 %v660_v0, %v175_v3  ;;  %v215_v7 = vmul.f32 %v660_v0, %v176_v4  ;;  %v177_v8 = vld [vmem:[%s665_s20 + $0x18] sm:$0xff]  ;;  %v178_v9 = vld [vmem:[%s665_s20 + $0x20] sm:$0xff]  ;;  %v179_v10 = vld [vmem:[%s665_s20 + $0x28] sm:$0xff] }
  0x12   : > { %v216_v11 = vmul.f32 %v660_v0, %v177_v8  ;;  %v217_v12 = vmul.f32 %v660_v0, %v178_v9  ;;  %v218_v13 = vmul.f32 %v660_v0, %v179_v10  ;;  %v180_v14 = vld [vmem:[%s665_s20 + $0x30] sm:$0xff]  ;;  %v181_v15 = vld [vmem:[%s665_s20 + $0x38] sm:$0xff]  ;;  %v182_v32 = vld [vmem:[%s665_s20 + $0x40] sm:$0xff] }
  0x13   : > { %v252_v16 = vadd.f32 %v670_v1, %v213_v5  ;;  %v253_v17 = vadd.f32 %v670_v1, %v214_v6  ;;  %v254_v18 = vadd.f32 %v670_v1, %v215_v7  ;;  %v219_v19 = vmul.f32 %v660_v0, %v180_v14  ;;  %v183_v33 = vld [vmem:[%s665_s20 + $0x48] sm:$0xff]  ;;  %v184_v34 = vld [vmem:[%s665_s20 + $0x50] sm:$0xff]  ;;  %v185_v39 = vld [vmem:[%s665_s20 + $0x58] sm:$0xff] }
  0x14   : > { %v255_v20 = vadd.f32 %v670_v1, %v216_v11  ;;  %v256_v21 = vadd.f32 %v670_v1, %v217_v12  ;;  %v257_v22 = vadd.f32 %v670_v1, %v218_v13  ;;  %v220_v23 = vmul.f32 %v660_v0, %v181_v15  ;;  %v186_v40 = vld [vmem:[%s665_s20 + $0x60] sm:$0xff]  ;;  %v187_v41 = vld [vmem:[%s665_s20 + $0x68] sm:$0xff]  ;;  %v188_v46 = vld [vmem:[%s665_s20 + $0x70] sm:$0xff] }
  0x15   : > { %v284_v24 = vmax.f32 %v252_v16, 0.0  ;;  %v285_v25 = vmax.f32 %v253_v17, 0.0  ;;  %v286_v26 = vmax.f32 %v254_v18, 0.0  ;;  %v258_v27 = vadd.f32 %v670_v1, %v219_v19  ;;  %v189_v51 = vld [vmem:[%s665_s20 + $0x78] sm:$0xff]  ;;  %v190_v10 = vld [vmem:[%s665_s20 + $0x80] sm:$0xff]  ;;  %v191_v11 = vld [vmem:[%s665_s20 + $0x88] sm:$0xff] }
  0x16   : > { %v287_v28 = vmax.f32 %v255_v20, 0.0  ;;  %v288_v29 = vmax.f32 %v256_v21, 0.0  ;;  %v289_v30 = vmax.f32 %v257_v22, 0.0  ;;  %v259_v31 = vadd.f32 %v670_v1, %v220_v23  ;;  %v192_v12 = vld [vmem:[%s665_s20 + $0x90] sm:$0xff]  ;;  %v193_v17 = vld [vmem:[%s665_s20 + $0x98] sm:$0xff]  ;;  %v194_v18 = vld [vmem:[%s665_s20 + $0xa0] sm:$0xff] }
  0x17   : > { %v578_v35 = vpack.c.bf16 %v284_v24, %v284_v24  ;;  %v579_v36 = vpack.c.bf16 %v285_v25, %v285_v25  ;;  %v580_v37 = vpack.c.bf16 %v286_v26, %v286_v26  ;;  %v290_v38 = vmax.f32 %v258_v27, 0.0  ;;  %v195_v19 = vld [vmem:[%s665_s20 + $0xa8] sm:$0xff]  ;;  %v196_v24 = vld [vmem:[%s665_s20 + $0xb0] sm:$0xff] }
  0x18   : > { %v581_v42 = vpack.c.bf16 %v287_v28, %v287_v28  ;;  %v582_v43 = vpack.c.bf16 %v288_v29, %v288_v29  ;;  %v583_v44 = vpack.c.bf16 %v289_v30, %v289_v30  ;;  %v291_v45 = vmax.f32 %v259_v31, 0.0  ;;  %v197_v29 = vld [vmem:[%s665_s20 + $0xb8] sm:$0xff] }
  0x19   : > { %445 = vst.msk [vmem:[%s699_s26] sm:$0xf] %vm444_vm0, %v578_v35  ;;  %446 = vst.msk [vmem:[%s699_s26 + $0x4] sm:$0xf] %vm444_vm0, %v579_v36  ;;  %v584_v47 = vpack.c.bf16 %v290_v38, %v290_v38  ;;  %v221_v48 = vmul.f32 %v660_v0, %v182_v32  ;;  %v222_v49 = vmul.f32 %v660_v0, %v183_v33 }
  0x1a   : > { %447 = vst.msk [vmem:[%s699_s26 + $0x8] sm:$0xf] %vm444_vm0, %v580_v37  ;;  %v223_v50 = vmul.f32 %v660_v0, %v184_v34  ;;  %448 = vst.msk [vmem:[%s699_s26 + $0xc] sm:$0xf] %vm444_vm0, %v581_v42  ;;  %v585_v52 = vpack.c.bf16 %v291_v45, %v291_v45  ;;  %v224_v53 = vmul.f32 %v660_v0, %v185_v39 }
  0x1b   : > { %449 = vst.msk [vmem:[%s699_s26 + $0x10] sm:$0xf] %vm444_vm0, %v582_v43  ;;  %450 = vst.msk [vmem:[%s699_s26 + $0x14] sm:$0xf] %vm444_vm0, %v583_v44  ;;  %v225_v54 = vmul.f32 %v660_v0, %v186_v40  ;;  %v226_v55 = vmul.f32 %v660_v0, %v187_v41  ;;  %v260_v56 = vadd.f32 %v670_v1, %v221_v48 }
  0x1c   : > { %451 = vst.msk [vmem:[%s699_s26 + $0x18] sm:$0xf] %vm444_vm0, %v584_v47  ;;  %v261_v57 = vadd.f32 %v670_v1, %v222_v49  ;;  %v262_v58 = vadd.f32 %v670_v1, %v223_v50  ;;  %v227_v59 = vmul.f32 %v660_v0, %v188_v46  ;;  %452 = vst.msk [vmem:[%s699_s26 + $0x1c] sm:$0xf] %vm444_vm0, %v585_v52  ;;  %v198_v50 = vld [vmem:[%s665_s20 + $0xc0] sm:$0xff]  ;;  %v200_v52 = vld [vmem:[%s665_s20 + $0xd0] sm:$0xff] }
  0x1d   : > { %v263_v60 = vadd.f32 %v670_v1, %v224_v53  ;;  %v264_v61 = vadd.f32 %v670_v1, %v225_v54  ;;  %v265_v62 = vadd.f32 %v670_v1, %v226_v55  ;;  %v228_v63 = vmul.f32 %v660_v0, %v189_v51  ;;  %v199_v51 = vld [vmem:[%s665_s20 + $0xc8] sm:$0xff] }
  0x1e   : > { %v292_v2 = vmax.f32 %v260_v56, 0.0  ;;  %v293_v3 = vmax.f32 %v261_v57, 0.0  ;;  %v294_v4 = vmax.f32 %v262_v58, 0.0  ;;  %v266_v5 = vadd.f32 %v670_v1, %v227_v59  ;;  %v201_v57 = vld [vmem:[%s665_s20 + $0xd8] sm:$0xff]  ;;  %v202_v58 = vld [vmem:[%s665_s20 + $0xe0] sm:$0xff]  ;;  %v203_v59 = vld [vmem:[%s665_s20 + $0xe8] sm:$0xff] }
  0x1f   : > { %v295_v6 = vmax.f32 %v263_v60, 0.0  ;;  %v296_v7 = vmax.f32 %v264_v61, 0.0  ;;  %v297_v8 = vmax.f32 %v265_v62, 0.0  ;;  %v267_v9 = vadd.f32 %v670_v1, %v228_v63 }
  0x20   : > { %v586_v13 = vpack.c.bf16 %v292_v2, %v292_v2  ;;  %v587_v14 = vpack.c.bf16 %v293_v3, %v293_v3  ;;  %v588_v15 = vpack.c.bf16 %v294_v4, %v294_v4  ;;  %v298_v16 = vmax.f32 %v266_v5, 0.0  ;;  %v204_v2 = vld [vmem:[%s665_s20 + $0xf0] sm:$0xff] }
  0x21   : > { %v589_v20 = vpack.c.bf16 %v295_v6, %v295_v6  ;;  %v590_v21 = vpack.c.bf16 %v296_v7, %v296_v7  ;;  %v591_v22 = vpack.c.bf16 %v297_v8, %v297_v8  ;;  %v299_v23 = vmax.f32 %v267_v9, 0.0  ;;  %v205_v7 = vld [vmem:[%s665_s20 + $0xf8] sm:$0xff] }
  0x22   : > { %453 = vst.msk [vmem:[%s699_s26 + $0x20] sm:$0xf] %vm444_vm0, %v586_v13  ;;  %454 = vst.msk [vmem:[%s699_s26 + $0x24] sm:$0xf] %vm444_vm0, %v587_v14  ;;  %v592_v25 = vpack.c.bf16 %v298_v16, %v298_v16  ;;  %v229_v26 = vmul.f32 %v660_v0, %v190_v10  ;;  %v230_v27 = vmul.f32 %v660_v0, %v191_v11 }
  0x23   : > { %455 = vst.msk [vmem:[%s699_s26 + $0x28] sm:$0xf] %vm444_vm0, %v588_v15  ;;  %v231_v28 = vmul.f32 %v660_v0, %v192_v12  ;;  %456 = vst.msk [vmem:[%s699_s26 + $0x2c] sm:$0xf] %vm444_vm0, %v589_v20  ;;  %v593_v30 = vpack.c.bf16 %v299_v23, %v299_v23  ;;  %v232_v31 = vmul.f32 %v660_v0, %v193_v17 }
  0x24   : > { %457 = vst.msk [vmem:[%s699_s26 + $0x30] sm:$0xf] %vm444_vm0, %v590_v21  ;;  %458 = vst.msk [vmem:[%s699_s26 + $0x34] sm:$0xf] %vm444_vm0, %v591_v22  ;;  %v233_v32 = vmul.f32 %v660_v0, %v194_v18  ;;  %v234_v33 = vmul.f32 %v660_v0, %v195_v19  ;;  %v268_v34 = vadd.f32 %v670_v1, %v229_v26 }
  0x25   : > { %459 = vst.msk [vmem:[%s699_s26 + $0x38] sm:$0xf] %vm444_vm0, %v592_v25  ;;  %v269_v35 = vadd.f32 %v670_v1, %v230_v27  ;;  %v270_v36 = vadd.f32 %v670_v1, %v231_v28  ;;  %v235_v37 = vmul.f32 %v660_v0, %v196_v24  ;;  %460 = vst.msk [vmem:[%s699_s26 + $0x3c] sm:$0xf] %vm444_vm0, %v593_v30 }
  0x26   : > { %v271_v38 = vadd.f32 %v670_v1, %v232_v31  ;;  %v272_v39 = vadd.f32 %v670_v1, %v233_v32  ;;  %v273_v40 = vadd.f32 %v670_v1, %v234_v33  ;;  %v236_v41 = vmul.f32 %v660_v0, %v197_v29 }
  0x27   : > { %v300_v42 = vmax.f32 %v268_v34, 0.0  ;;  %v301_v43 = vmax.f32 %v269_v35, 0.0  ;;  %v302_v44 = vmax.f32 %v270_v36, 0.0  ;;  %v274_v45 = vadd.f32 %v670_v1, %v235_v37 }
  0x28   : > { %v303_v46 = vmax.f32 %v271_v38, 0.0  ;;  %v304_v47 = vmax.f32 %v272_v39, 0.0  ;;  %v305_v48 = vmax.f32 %v273_v40, 0.0  ;;  %v275_v49 = vadd.f32 %v670_v1, %v236_v41 }
  0x29   : > { %v594_v53 = vpack.c.bf16 %v300_v42, %v300_v42  ;;  %v595_v54 = vpack.c.bf16 %v301_v43, %v301_v43  ;;  %v596_v55 = vpack.c.bf16 %v302_v44, %v302_v44  ;;  %v306_v56 = vmax.f32 %v274_v45, 0.0 }
  0x2a   : > { %v597_v60 = vpack.c.bf16 %v303_v46, %v303_v46  ;;  %v598_v61 = vpack.c.bf16 %v304_v47, %v304_v47  ;;  %v599_v62 = vpack.c.bf16 %v305_v48, %v305_v48  ;;  %v307_v63 = vmax.f32 %v275_v49, 0.0 }
  0x2b   : > { %461 = vst.msk [vmem:[%s699_s26 + $0x40] sm:$0xf] %vm444_vm0, %v594_v53  ;;  %462 = vst.msk [vmem:[%s699_s26 + $0x44] sm:$0xf] %vm444_vm0, %v595_v54  ;;  %v600_v3 = vpack.c.bf16 %v306_v56, %v306_v56  ;;  %v237_v4 = vmul.f32 %v660_v0, %v198_v50  ;;  %v238_v5 = vmul.f32 %v660_v0, %v199_v51 }
  0x2c   : > { %463 = vst.msk [vmem:[%s699_s26 + $0x48] sm:$0xf] %vm444_vm0, %v596_v55  ;;  %v239_v6 = vmul.f32 %v660_v0, %v200_v52  ;;  %464 = vst.msk [vmem:[%s699_s26 + $0x4c] sm:$0xf] %vm444_vm0, %v597_v60  ;;  %v601_v8 = vpack.c.bf16 %v307_v63, %v307_v63  ;;  %v240_v9 = vmul.f32 %v660_v0, %v201_v57 }
  0x2d   : > { %465 = vst.msk [vmem:[%s699_s26 + $0x50] sm:$0xf] %vm444_vm0, %v598_v61  ;;  %466 = vst.msk [vmem:[%s699_s26 + $0x54] sm:$0xf] %vm444_vm0, %v599_v62  ;;  %v241_v10 = vmul.f32 %v660_v0, %v202_v58  ;;  %v242_v11 = vmul.f32 %v660_v0, %v203_v59  ;;  %v276_v12 = vadd.f32 %v670_v1, %v237_v4 }
  0x2e   : > { %467 = vst.msk [vmem:[%s699_s26 + $0x58] sm:$0xf] %vm444_vm0, %v600_v3  ;;  %v277_v13 = vadd.f32 %v670_v1, %v238_v5  ;;  %v278_v14 = vadd.f32 %v670_v1, %v239_v6  ;;  %v243_v15 = vmul.f32 %v660_v0, %v204_v2  ;;  %468 = vst.msk [vmem:[%s699_s26 + $0x5c] sm:$0xf] %vm444_vm0, %v601_v8 }
  0x2f   : > { %v279_v16 = vadd.f32 %v670_v1, %v240_v9  ;;  %v280_v17 = vadd.f32 %v670_v1, %v241_v10  ;;  %v281_v18 = vadd.f32 %v670_v1, %v242_v11  ;;  %v244_v19 = vmul.f32 %v660_v0, %v205_v7 }
  0x30   : > { %v308_v20 = vmax.f32 %v276_v12, 0.0  ;;  %v309_v21 = vmax.f32 %v277_v13, 0.0  ;;  %v310_v22 = vmax.f32 %v278_v14, 0.0  ;;  %v282_v23 = vadd.f32 %v670_v1, %v243_v15 }
  0x31   : > { %v311_v24 = vmax.f32 %v279_v16, 0.0  ;;  %v312_v25 = vmax.f32 %v280_v17, 0.0  ;;  %v313_v26 = vmax.f32 %v281_v18, 0.0  ;;  %v283_v27 = vadd.f32 %v670_v1, %v244_v19 }
  0x32   : > { %v602_v28 = vpack.c.bf16 %v308_v20, %v308_v20  ;;  %v603_v29 = vpack.c.bf16 %v309_v21, %v309_v21  ;;  %v604_v0 = vpack.c.bf16 %v310_v22, %v310_v22  ;;  %v314_v30 = vmax.f32 %v282_v23, 0.0 }
  0x33   : > { %v605_v31 = vpack.c.bf16 %v311_v24, %v311_v24  ;;  %v606_v32 = vpack.c.bf16 %v312_v25, %v312_v25  ;;  %v607_v33 = vpack.c.bf16 %v313_v26, %v313_v26  ;;  %v315_v34 = vmax.f32 %v283_v27, 0.0 }
  0x34   : > { %469 = vst.msk [vmem:[%s699_s26 + $0x60] sm:$0xf] %vm444_vm0, %v602_v28  ;;  %470 = vst.msk [vmem:[%s699_s26 + $0x64] sm:$0xf] %vm444_vm0, %v603_v29  ;;  %v608_v35 = vpack.c.bf16 %v314_v30, %v314_v30 }
  0x35   : > { %471 = vst.msk [vmem:[%s699_s26 + $0x68] sm:$0xf] %vm444_vm0, %v604_v0  ;;  %472 = vst.msk [vmem:[%s699_s26 + $0x6c] sm:$0xf] %vm444_vm0, %v605_v31  ;;  %v609_v1 = vpack.c.bf16 %v315_v34, %v315_v34 }
  0x36   : > { %473 = vst.msk [vmem:[%s699_s26 + $0x70] sm:$0xf] %vm444_vm0, %v606_v32  ;;  %474 = vst.msk [vmem:[%s699_s26 + $0x74] sm:$0xf] %vm444_vm0, %v607_v33 }
  0x37   : > { %475 = vst.msk [vmem:[%s699_s26 + $0x78] sm:$0xf] %vm444_vm0, %v608_v35  ;;  %476 = vst.msk [vmem:[%s699_s26 + $0x7c] sm:$0xf] %vm444_vm0, %v609_v1 }
  0x38 PF: > { %s13_s12 = sadd.s32 1, %s624_s12  }
  0x39   : > { %p10_p4 = scmp.ge.s32.totalorder %s13_s12, 4  }
  0x3b   :  { %12 = sbr.rel (!%p10_p4) target bundleno = 1 (0x1), region = 62 }

// kernel: conv_block_forward.6
= control target key start
LH: loop header
LB: loop body
LE: loop exit
PB: predicated region body
PF: predicated region fallthrough
CT: control target
= control target key end

     0   :  { %s1297_s18 = smov 0   ;;  %s1299_s19 = smov 0   ;;  %s1463_s0 = inlined_call_operand.vmem [shape: bf16[2,18,18,4], index: 0, kind: input, shape index: {}, may-alias: {0,1,2}]   ;;  %s1464_s1 = inlined_call_operand.vmem [shape: bf16[2,18,18,4], index: 1, kind: input, shape index: {}, may-alias: {0,1,2}]   ;;  %s1465_s2 = inlined_call_operand.vmem [shape: bf16[2,18,18,4], index: 2, kind: input, shape index: {}, may-alias: {0,1,2}]   ;;  %s1466_s3 = inlined_call_operand.vmem [shape: bf16[9,4,8], index: 3, kind: input, shape index: {}]   ;;  %s1467_s4 = inlined_call_operand.vmem [shape: f32[1,8], index: 4, kind: input, shape index: {}]   ;;  %s1468_s5 = inlined_call_operand.vmem [shape: f32[2,16,16,8], index: 5, kind: output, shape index: {}]  }
   0x1   :  { %s1301_s20 = smov 0   ;;  %s1303_s21 = smov 0  }
   0x2   :  { %s1305_s22 = smov 0  }
   0x3 LB: > { %s24_s23 = sadd.s32 1, %s1255_s20  ;;  %s27_s24 = sadd.s32 1, %s1259_s21  ;;  %s1263_s22 = sphi %s1305_s22, %s15_s22   ;;  %s1259_s21 = sphi %s1303_s21, %s1472_s21   ;;  %s1255_s20 = sphi %s1301_s20, %s1471_s20   ;;  %s1251_s19 = sphi %s1299_s19, %s1470_s19   ;;  %s1247_s18 = sphi %s1297_s18, %s1469_s18  }
   0x4   : > { %p25_p0 = scmp.ge.s32.totalorder %s24_s23, 16  ;;  %p1058_p1 = scmp.ge.s32.totalorder %s1263_s22, 1 }
   0x5   : > { %p247_p2 = scmp.lt.s32.totalorder %s1263_s22, 33 }
   0x6   : > { %s1474_s23 = smov (%p25_p0, %s24_s23), 0  ;;  %s1476_s24 = smov (!%p25_p0, %s27_s24), %s1259_s21 }
   0x7   : > { %p248_p3 = pnand %p1058_p1, %p247_p2  ;;  %p29_p4 = scmp.ge.s32.totalorder %s1476_s24, 2 }
   0x8   : > { %v1065_v0 = vld [vmem:[%s1466_s3 + $0x2] sm:$0x3] (!%p248_p3)  ;;  %vm375_vm0 = vcmask (!%p248_p3), 1041408   ;;  %v346_v1 = vld [vmem:[%s1466_s3] sm:$0x3] (!%p248_p3)  ;;  %v1265_v2 = vmov (!%p248_p3), 0.0  }
   0x9   : > { %s1478_s24 = smov (%p29_p4, %s1476_s24), 0  ;;  %251 = sbr.rel (%p248_p3) target bundleno = 285 (0x11d), region = 40 }
   0xa   : > { %1114 = vmatprep.subr.bf16.mxu0 (!%p248_p3), %v1265_v2  ;;  %v377_v3 = vsel (!%p248_p3), %vm375_vm0, %v1065_v0, 0  ;;  %1120 = vmatprep.subr.bf16.mxu1 (!%p248_p3), %v1265_v2  ;;  %v423_v4 = vsel (!%p248_p3), %vm375_vm0, %v346_v1, 0  ;;  %p303_p5 = scmp.lt.s32.totalorder (!%p248_p3), %s1251_s19, 1  ;;  %p305_p6 = scmp.lt.s32.totalorder (!%p248_p3), %s1247_s18, 17  ;;  %vm1266_vm1 = vmmov (!%p248_p3), 0   ;;  %vm371_vm2 = vcmask (!%p248_p3), 31744  }
   0xb   : > { %1115 = vmatpush3.bf16.msra.mxu0 (!%p248_p3), %v377_v3  ;;  %1121 = vmatpush3.bf16.msra.mxu1 (!%p248_p3), %v423_v4  ;;  %s312_s6 = sadd.s32 (!%p248_p3), 1, %s1247_s18  ;;  %s323_s8 = sadd.s32 (!%p248_p3), 2, %s1247_s18  ;;  %v1073_v5 = vld [vmem:[%s1466_s3 + $0x6] sm:$0x3] (!%p248_p3)  ;;  %v1070_v15 = vld [vmem:[%s1466_s3 + $0x4] sm:$0x3] (!%p248_p3) }
   0xc   : > { %1116 = vmatprep.mubr.msk.bf16.mxu0 (!%p248_p3), %vm1266_vm1, %v1265_v2  ;;  %1122 = vmatprep.mubr.msk.bf16.mxu1 (!%p248_p3), %vm1266_vm1, %v1265_v2  ;;  %p315_p7 = scmp.lt.s32.totalorder (!%p248_p3), %s312_s6, 17  ;;  %p326_p8 = scmp.lt.s32.totalorder (!%p248_p3), %s323_s8, 17  ;;  %v538_v10 = vsel (!%p248_p3), %vm375_vm0, %v1073_v5, 0  ;;  %v1080_v16 = vld [vmem:[%s1466_s3 + $0xa] sm:$0x3] (!%p248_p3)  ;;  %v480_v21 = vsel (!%p248_p3), %vm375_vm0, %v1070_v15, 0 }
   0xd   : > { %1126 = vmatprep.subr.bf16.mxu0 (!%p248_p3), %v1265_v2  ;;  %1132 = vmatprep.subr.bf16.mxu1 (!%p248_p3), %v1265_v2  ;;  %vm358_vm3 = vsmask.f32 (!%p248_p3), 7424  ;;  %vm472_vm4 = vcmask (!%p248_p3), 1046528   ;;  %v670_v22 = vsel (!%p248_p3), %vm375_vm0, %v1080_v16, 0  ;;  %v1076_v34 = vld [vmem:[%s1466_s3 + $0x8] sm:$0x3] (!%p248_p3) }
   0xe   : > { %v1086_v45 = vld [vmem:[%s1466_s3 + $0xe] sm:$0x3] (!%p248_p3)  ;;  %v612_v47 = vsel (!%p248_p3), %vm375_vm0, %v1076_v34, 0  ;;  %v1083_v55 = vld [vmem:[%s1466_s3 + $0xc] sm:$0x3] (!%p248_p3)  ;;  %p336_p9 = scmp.lt.s32.totalorder (!%p248_p3), %s1247_s18, 15 }
   0xf   : > { %v802_v52 = vsel (!%p248_p3), %vm375_vm0, %v1086_v45, 0  ;;  %v728_v59 = vsel (!%p248_p3), %vm375_vm0, %v1083_v55, 0  ;;  %v1090_v62 = vld [vmem:[%s1466_s3 + $0x10] sm:$0x3] (!%p248_p3)  ;;  %vm914_vm5 = vcmask (!%p248_p3), 64512  }
  0x10   : > { %s1480_s19 = smov (!%p303_p5, %s1251_s19), 1  ;;  %s1482_s6 = smov (!%p315_p7, %s312_s6), 17  ;;  %v860_v1 = vsel %vm375_vm0, %v1090_v62, 0 }
  0x11   : > { %s306_s29 = scalar_select %p305_p6, %s1247_s18, 17 }
  0x12   : > { %s1354_s30 = smul.u32 54, %s1480_s19  ;;  %s1484_s8 = smov (!%p326_p8, %s323_s8), 17 }
  0x13   : > { %s1168_s7 = smul.u32 3, %s306_s29  ;;  %s1486_s18 = smov (!%p336_p9, %s1247_s18), 15 }
  0x14   : > { %s1170_s16 = smul.u32 3, %s1482_s6 }
  0x15   : > { %s309_s9 = sadd.s32 %s1354_s30, %s1168_s7  ;;  %s1171_s28 = smul.u32 3, %s1484_s8 }
  0x16   : > { %s1059_s10 = sshll.u32 %s309_s9, 2  ;;  %s319_s29 = sadd.s32 %s1170_s16, %s1354_s30 }
  0x17   : > { %s311_s15 = scalar_lea.vmem %s1463_s0, %s1059_s10  ;;  %s1060_s6 = sshll.u32 %s319_s29, 2 }
  0x18   : > { %v344_v6 = vld [vmem:[%s311_s15] sm:$0xf]  ;;  %v345_v7 = vld [vmem:[%s311_s15 + $0x4] sm:$0xf]  ;;  %s330_s7 = sadd.s32 %s1171_s28, %s1354_s30  ;;  %s321_s11 = scalar_lea.vmem %s1464_s1, %s1060_s6 }
  0x19   : > { %v1066_v8 = vcombine.low %v344_v6, %v345_v7  ;;  %v1215_v9 = vld [vmem:[%s311_s15 + $0x8] ss:$0 sps:$4 sm:$0x11]   ;;  %v466_v14 = vld [vmem:[%s311_s15] sm:$0xe]  ;;  %s1061_s8 = sshll.u32 %s330_s7, 2 }
  0x1a   : > { %v367_v13 = vshll.u32 %v1215_v9, 16  ;;  %v1071_v19 = vcombine.low %v466_v14, %v345_v7  ;;  %v474_v23 = vrot.slane %v1215_v9, 1  ;;  %v1217_v24 = vld [vmem:[%s321_s11] sm:$0xff]   ;;  %s1386_s14 = scalar_lea.vmem %s1465_s2, %s1061_s8  ;;  %v1219_v30 = vld [vmem:[%s321_s11 + $0x8] ss:$0 sps:$4 sm:$0x11]  }
  0x1b   : > { %v360_v11 = vshrl.u32 %v1066_v8, 16  ;;  %v362_v12 = vshll.u32 %v1066_v8, 16  ;;  %1123 = vmatmul.mubr.msk.bf16.vlgmr.msra.gmra.mrb[0].mxu1 %vm371_vm2, %v1066_v8  ;;  %v583_v26 = vld [vmem:[%s321_s11] sm:$0xf]  ;;  %v584_v27 = vld [vmem:[%s321_s11 + $0x4] sm:$0xf] }
  0x1c   : > { %1133 = vmatpush3.bf16.msra.mxu1 %v538_v10  ;;  %1134 = vmatprep.mubr.msk.bf16.mxu1 %vm1266_vm1, %v1265_v2  ;;  %v369_v18 = vrot.slane %v367_v13, 1  ;;  %v473_v28 = vrot.slane %v1071_v19, 1  ;;  %v1077_v29 = vcombine.low %v583_v26, %v584_v27  ;;  %v657_v31 = vld [vmem:[%s321_s11] sm:$0xe]  ;;  %v664_v36 = vrot.slane %v1219_v30, 1  ;;  %s1062_s29 = sshll.u32 %s1486_s18, 1 }
  0x1d   : > { %v364_v17 = vrot.slane %v362_v12, 1  ;;  %1144 = vmatprep.subr.bf16.mxu1 %v1265_v2  ;;  %v1081_v32 = vcombine.low %v657_v31, %v584_v27  ;;  %v773_v33 = vld [vmem:[%s1386_s14] sm:$0xf]  ;;  %v774_v37 = vld [vmem:[%s1386_s14 + $0x4] sm:$0xf]  ;;  %v604_v44 = vshll.u32 %v1219_v30, 16 }
  0x1e   : > { %v599_v35 = vshll.u32 %v1077_v29, 16  ;;  %v1087_v39 = vcombine.low %v773_v33, %v774_v37  ;;  %v1223_v40 = vld [vmem:[%s1386_s14 + $0x8] ss:$0 sps:$4 sm:$0x11]   ;;  %v475_v41 = vsel %vm472_vm4, %v473_v28, %v474_v23  ;;  %v597_v42 = vshrl.u32 %v1077_v29, 16  ;;  %v1221_v63 = vld [vmem:[%s1386_s14] sm:$0xff]  }
  0x1f   : > { %v365_v20 = vor.u32 %v364_v17, %v360_v11  ;;  %v663_v38 = vrot.slane %v1081_v32, 1  ;;  %v794_v51 = vshll.u32 %v1223_v40, 16  ;;  %v606_v54 = vrot.slane %v604_v44, 1  ;;  %v847_v61 = vld [vmem:[%s1386_s14] sm:$0xe]  ;;  %s1063_s6 = sshll.u32 %s1480_s19, 5 }
  0x20   : > { %v601_v43 = vrot.slane %v599_v35, 1  ;;  %v789_v46 = vshll.u32 %v1087_v39, 16  ;;  %v787_v49 = vshrl.u32 %v1087_v39, 16  ;;  %v1091_v0 = vcombine.low %v847_v61, %v774_v37  ;;  %s340_s7 = sadd.s32 %s1063_s6, %s1062_s29 }
  0x21   : > { %v370_v25 = vsel %vm358_vm3, %v365_v20, %v369_v18  ;;  %v665_v48 = vsel %vm472_vm4, %v663_v38, %v664_v36  ;;  %v796_v57 = vrot.slane %v794_v51, 1  ;;  %v854_v4 = vrot.slane %v1223_v40, 1  ;;  %s1064_s9 = sshll.u32 %s340_s7, 3 }
  0x22   : > { %1117 = vmatmul.mubr.msk.bf16.vlgmr.msra.gmra.mrb[0].mxu0 %vm371_vm2, %v370_v25  ;;  %v791_v50 = vrot.slane %v789_v46, 1  ;;  %v602_v53 = vor.u32 %v601_v43, %v597_v42  ;;  %v853_v3 = vrot.slane %v1091_v0, 1  ;;  %s342_s13 = scalar_lea.vmem %s1468_s5, %s1064_s9 }
  0x23   : > { %1127 = vmatpush3.bf16.msra.mxu0 %v480_v21  ;;  %1128 = vmatprep.mubr.msk.bf16.mxu0 %vm1266_vm1, %v1265_v2 }
  0x24   : > { %1138 = vmatprep.subr.bf16.mxu0 %v1265_v2  ;;  %1135 = vmatmul.mubr.msk.bf16.vlgmr.msra.gmra.mrb[4].mxu1 %vm371_vm2, %v1217_v24  ;;  %v792_v56 = vor.u32 %v791_v50, %v787_v49  ;;  %v607_v58 = vsel %vm358_vm3, %v602_v53, %v606_v54  ;;  %v855_v5 = vsel %vm472_vm4, %v853_v3, %v854_v4 }
  0x25   : > { %1145 = vmatpush3.bf16.msra.mxu1 %v670_v22  ;;  %1146 = vmatprep.mubr.msk.bf16.mxu1 %vm1266_vm1, %v1265_v2 }
  0x26   : > { %1156 = vmatprep.subr.bf16.mxu1 %v1265_v2  ;;  %v797_v60 = vsel %vm358_vm3, %v792_v56, %v796_v57 }
  0x2a   : > { %1129 = vmatmul.mubr.msk.bf16.vlgmr.msra.gmra.mrb[4].mxu0 %vm371_vm2, %v475_v41 }
  0x2b   : > { %1139 = vmatpush3.bf16.msra.mxu0 %v612_v47  ;;  %1140 = vmatprep.mubr.msk.bf16.mxu0 %vm1266_vm1, %v1265_v2 }
  0x2c   : > { %1150 = vmatprep.subr.bf16.mxu0 %v1265_v2  ;;  %1147 = vmatmul.mubr.msk.bf16.vlgmr.msra.gmra.mrb[8].mxu1 %vm371_vm2, %v665_v48 }
  0x2d   : > { %1157 = vmatpush3.bf16.msra.mxu1 %v802_v52  ;;  %1158 = vmatprep.mubr.msk.bf16.mxu1 %vm1266_vm1, %v1265_v2  ;;  %v1093_v52 = vld [vmem:[%s1467_s4] ss:$0 sm:$0xff] }
  0x32   : > { %1141 = vmatmul.mubr.msk.bf16.vlgmr.msra.gmra.mrb[8].mxu0 %vm371_vm2, %v607_v58 }
  0x33   : > { %1151 = vmatpush3.bf16.msra.mxu0 %v728_v59  ;;  %1152 = vmatprep.mubr.msk.bf16.mxu0 %vm1266_vm1, %v1265_v2 }
  0x34   : > { %1162 = vmatprep.subr.bf16.mxu0 %v1265_v2  ;;  %1159 = vmatmul.mubr.msk.bf16.vlgmr.msra.gmra.mrb[12].mxu1 %vm371_vm2, %v797_v60 }
  0x3a   : > { %1153 = vmatmul.mubr.msk.bf16.vlgmr.msra.gmra.mrb[12].mxu0 %vm371_vm2, %v1221_v63 }
  0x3b   : > { %1163 = vmatpush3.bf16.msra.mxu0 %v860_v1  ;;  %1164 = vmatprep.mubr.msk.bf16.mxu0 %vm1266_vm1, %v1265_v2 }
  0x42   : > { %1165 = vmatmul.mubr.msk.bf16.vlgmr.msra.gmra.mrb[16].mxu0 %vm371_vm2, %v855_v5 }
  0xee   : > { %v459_v6 = vpop.f32.mrb[0].mxu1 }
  0xef   : > { %v1124_v7 = vpop.f32.mrb[1].mxu1 }
  0xf0   : > { %v462_v8 = vpop.f32.mrb[2].mxu1 }
  0xf1   : > { %v1125_v9 = vpop.f32.mrb[3].mxu1 }
  0xf5   : > { %v413_v10 = vpop.f32.mrb[0].mxu0 }
  0xf6   : > { %v460_v11 = vadd.f32 %v459_v6, %v413_v10  ;;  %v1118_v12 = vpop.f32.mrb[1].mxu0 }
  0xf7   : > { %v416_v13 = vpop.f32.mrb[2].mxu0  ;;  %v574_v14 = vpop.f32.mrb[4].mxu1 }
  0xf8   : > { %v463_v15 = vadd.f32 %v462_v8, %v416_v13  ;;  %v1119_v16 = vpop.f32.mrb[3].mxu0  ;;  %v1136_v17 = vpop.f32.mrb[5].mxu1 }
  0xf9   : > { %v577_v18 = vpop.f32.mrb[6].mxu1 }
  0xfa   : > { %v1137_v2 = vpop.f32.mrb[7].mxu1 }
  0xfd   : > { %v516_v19 = vpop.f32.mrb[4].mxu0 }
  0xfe   : > { %v523_v20 = vadd.f32 %v516_v19, %v460_v11  ;;  %v1130_v21 = vpop.f32.mrb[5].mxu0 }
  0xff   : > { %v519_v22 = vpop.f32.mrb[6].mxu0  ;;  %v706_v23 = vpop.f32.mrb[8].mxu1 }
 0x100   : > { %v524_v24 = vadd.f32 %v519_v22, %v463_v15  ;;  %v581_v25 = vadd.f32 %v574_v14, %v523_v20  ;;  %v1131_v26 = vpop.f32.mrb[7].mxu0  ;;  %v1148_v27 = vpop.f32.mrb[9].mxu1 }
 0x101   : > { %v709_v28 = vpop.f32.mrb[10].mxu1 }
 0x102   : > { %v582_v29 = vadd.f32 %v577_v18, %v524_v24  ;;  %v1149_v30 = vpop.f32.mrb[11].mxu1 }
 0x105   : > { %v648_v31 = vpop.f32.mrb[8].mxu0 }
 0x106   : > { %v655_v32 = vadd.f32 %v648_v31, %v581_v25  ;;  %v1142_v33 = vpop.f32.mrb[9].mxu0 }
 0x107   : > { %v651_v34 = vpop.f32.mrb[10].mxu0  ;;  %v838_v35 = vpop.f32.mrb[12].mxu1 }
 0x108   : > { %v656_v36 = vadd.f32 %v651_v34, %v582_v29  ;;  %v713_v37 = vadd.f32 %v706_v23, %v655_v32  ;;  %v1143_v38 = vpop.f32.mrb[11].mxu0  ;;  %v1160_v39 = vpop.f32.mrb[13].mxu1 }
 0x109   : > { %v841_v40 = vpop.f32.mrb[14].mxu1 }
 0x10a   : > { %v714_v41 = vadd.f32 %v709_v28, %v656_v36  ;;  %v1161_v42 = vpop.f32.mrb[15].mxu1 }
 0x10d   : > { %v764_v43 = vpop.f32.mrb[12].mxu0 }
 0x10e   : > { %v771_v44 = vadd.f32 %v764_v43, %v713_v37  ;;  %v1154_v45 = vpop.f32.mrb[13].mxu0 }
 0x10f   : > { %v767_v46 = vpop.f32.mrb[14].mxu0 }
 0x110   : > { %v772_v47 = vadd.f32 %v767_v46, %v714_v41  ;;  %v845_v48 = vadd.f32 %v838_v35, %v771_v44  ;;  %v1155_v49 = vpop.f32.mrb[15].mxu0 }
 0x112   : > { %v846_v50 = vadd.f32 %v841_v40, %v772_v47 }
 0x115   : > { %v896_v51 = vpop.f32.mrb[16].mxu0 }
 0x116   : > { %v903_v53 = vadd.f32 %v896_v51, %v845_v48  ;;  %v1166_v54 = vpop.f32.mrb[17].mxu0 }
 0x117   : > { %v899_v55 = vpop.f32.mrb[18].mxu0 }
 0x118   : > { %v912_v56 = vadd.f32 %v1093_v52, %v903_v53  ;;  %v904_v57 = vadd.f32 %v899_v55, %v846_v50  ;;  %v1167_v58 = vpop.f32.mrb[19].mxu0 }
 0x11a   : > { %915 = vst.msk [vmem:[%s342_s13] sm:$0xff] %vm914_vm5, %v912_v56  ;;  %v913_v59 = vadd.f32 %v1093_v52, %v904_v57 }
 0x11c   : > { %916 = vst.msk [vmem:[%s342_s13 + $0x8] sm:$0xff] %vm914_vm5, %v913_v59 }
 0x11d PF: > { %s15_s22 = sadd.s32 1, %s1263_s22   ;;  %s1469_s18 = smov %s1255_s20 }
 0x11e   : > { %p12_p10 = scmp.ge.s32.totalorder %s15_s22, 34   ;;  %s1470_s19 = smov %s1259_s21 }
 0x11f   : > { %s1471_s20 = smov %s1474_s23  ;;  %s1472_s21 = smov %s1478_s24 }
 0x120   :  { %14 = sbr.rel (!%p12_p10) target bundleno = 3 (0x3), region = 84 }

// kernel: conv_block_forward.11
= control target key start
LH: loop header
LB: loop body
LE: loop exit
PB: predicated region body
PF: predicated region fallthrough
CT: control target
= control target key end

     0   :  { %s454_s12 = smov 0   ;;  %s645_s0 = inlined_call_operand.vmem [shape: f32[512,8], index: 0, kind: input, shape index: {}]   ;;  %s646_s1 = inlined_call_operand.vmem [shape: f32[1,8], index: 1, kind: input, shape index: {}]   ;;  %s647_s2 = inlined_call_operand.vmem [shape: f32[1,8], index: 2, kind: input, shape index: {}]   ;;  %s648_s3 = inlined_call_operand.vmem [shape: f32[512,8], index: 3, kind: output, shape index: {}]  }
   0x1 LB: > { %s405_s13 = sadd.s32 4294967295, %s432_s12   ;;  %p409_p0 = scmp.ge.s32.totalorder %s432_s12, 1  ;;  %s432_s12 = sphi %s454_s12, %s13_s12  }
   0x2   : > { %p138_p1 = scmp.lt.s32.totalorder %s432_s12, 3 }
   0x4   : > { %p139_p2 = pnand %p409_p0, %p138_p1 }
   0x5   : > { %s410_s14 = sshll.u32 (!%p139_p2), %s405_s13, 5  ;;  %v465_v0 = vld [vmem:[%s646_s1] ss:$0 sm:$0xff] (!%p139_p2)  ;;  %vm316_vm0 = vcmask (!%p139_p2), 64512  }
   0x6   : > { %142 = sbr.rel (%p139_p2) target bundleno = 46 (0x2e), region = 32  ;;  %p163_p3 = scmp.lt.s32.totalorder (!%p139_p2), %s410_s14, 63  ;;  %v475_v1 = vld [vmem:[%s647_s2] ss:$0 sm:$0xff] (!%p139_p2) }
   0xd   : > { %s650_s14 = smov (!%p163_p3, %s410_s14), 63 }
   0xe   : > { %s411_s15 = sshll.u32 %s650_s14, 3 }
   0xf   : > { %s470_s20 = scalar_lea.vmem %s645_s0, %s411_s15  ;;  %s498_s25 = scalar_lea.vmem %s648_s3, %s411_s15 }
  0x10   : > { %v174_v2 = vld [vmem:[%s470_s20] sm:$0xff]  ;;  %v175_v3 = vld [vmem:[%s470_s20 + $0x8] sm:$0xff]  ;;  %v176_v4 = vld [vmem:[%s470_s20 + $0x10] sm:$0xff] }
  0x11   : > { %v213_v5 = vmul.f32 %v465_v0, %v174_v2  ;;  %v214_v6 = vmul.f32 %v465_v0, %v175_v3  ;;  %v215_v7 = vmul.f32 %v465_v0, %v176_v4  ;;  %v177_v8 = vld [vmem:[%s470_s20 + $0x18] sm:$0xff]  ;;  %v178_v9 = vld [vmem:[%s470_s20 + $0x20] sm:$0xff]  ;;  %v179_v10 = vld [vmem:[%s470_s20 + $0x28] sm:$0xff] }
  0x12   : > { %v216_v11 = vmul.f32 %v465_v0, %v177_v8  ;;  %v217_v12 = vmul.f32 %v465_v0, %v178_v9  ;;  %v218_v13 = vmul.f32 %v465_v0, %v179_v10  ;;  %v180_v14 = vld [vmem:[%s470_s20 + $0x30] sm:$0xff]  ;;  %v181_v15 = vld [vmem:[%s470_s20 + $0x38] sm:$0xff]  ;;  %v182_v24 = vld [vmem:[%s470_s20 + $0x40] sm:$0xff] }
  0x13   : > { %v252_v16 = vadd.f32 %v475_v1, %v213_v5  ;;  %v253_v17 = vadd.f32 %v475_v1, %v214_v6  ;;  %v254_v18 = vadd.f32 %v475_v1, %v215_v7  ;;  %v219_v19 = vmul.f32 %v465_v0, %v180_v14  ;;  %v183_v25 = vld [vmem:[%s470_s20 + $0x48] sm:$0xff]  ;;  %v184_v26 = vld [vmem:[%s470_s20 + $0x50] sm:$0xff]  ;;  %v185_v31 = vld [vmem:[%s470_s20 + $0x58] sm:$0xff] }
  0x14   : > { %v255_v20 = vadd.f32 %v475_v1, %v216_v11  ;;  %v256_v21 = vadd.f32 %v475_v1, %v217_v12  ;;  %v257_v22 = vadd.f32 %v475_v1, %v218_v13  ;;  %v220_v23 = vmul.f32 %v465_v0, %v181_v15  ;;  %v186_v32 = vld [vmem:[%s470_s20 + $0x60] sm:$0xff]  ;;  %v187_v33 = vld [vmem:[%s470_s20 + $0x68] sm:$0xff]  ;;  %v188_v38 = vld [vmem:[%s470_s20 + $0x70] sm:$0xff] }
  0x15   : > { %v284_v27 = vmax.f32 %v252_v16, 0.0  ;;  %v285_v28 = vmax.f32 %v253_v17, 0.0  ;;  %v286_v29 = vmax.f32 %v254_v18, 0.0  ;;  %v258_v30 = vadd.f32 %v475_v1, %v219_v19  ;;  %v189_v43 = vld [vmem:[%s470_s20 + $0x78] sm:$0xff]  ;;  %v190_v56 = vld [vmem:[%s470_s20 + $0x80] sm:$0xff]  ;;  %v191_v57 = vld [vmem:[%s470_s20 + $0x88] sm:$0xff] }
  0x16   : > { %v287_v34 = vmax.f32 %v255_v20, 0.0  ;;  %v288_v35 = vmax.f32 %v256_v21, 0.0  ;;  %v289_v36 = vmax.f32 %v257_v22, 0.0  ;;  %v259_v37 = vadd.f32 %v475_v1, %v220_v23  ;;  %v192_v58 = vld [vmem:[%s470_s20 + $0x90] sm:$0xff]  ;;  %v193_v63 = vld [vmem:[%s470_s20 + $0x98] sm:$0xff]  ;;  %v194_v2 = vld [vmem:[%s470_s20 + $0xa0] sm:$0xff] }
  0x17   : > { %317 = vst.msk [vmem:[%s498_s25] sm:$0xff] %vm316_vm0, %v284_v27  ;;  %318 = vst.msk [vmem:[%s498_s25 + $0x8] sm:$0xff] %vm316_vm0, %v285_v28  ;;  %v290_v39 = vmax.f32 %v258_v30, 0.0  ;;  %v221_v40 = vmul.f32 %v465_v0, %v182_v24  ;;  %v222_v41 = vmul.f32 %v465_v0, %v183_v25  ;;  %v223_v42 = vmul.f32 %v465_v0, %v184_v26  ;;  %v195_v3 = vld [vmem:[%s470_s20 + $0xa8] sm:$0xff]  ;;  %v196_v8 = vld [vmem:[%s470_s20 + $0xb0] sm:$0xff] }
  0x18   : > { %319 = vst.msk [vmem:[%s498_s25 + $0x10] sm:$0xff] %vm316_vm0, %v286_v29  ;;  %320 = vst.msk [vmem:[%s498_s25 + $0x18] sm:$0xff] %vm316_vm0, %v287_v34  ;;  %v291_v44 = vmax.f32 %v259_v37, 0.0  ;;  %v224_v45 = vmul.f32 %v465_v0, %v185_v31  ;;  %v225_v46 = vmul.f32 %v465_v0, %v186_v32  ;;  %v226_v47 = vmul.f32 %v465_v0, %v187_v33  ;;  %v197_v13 = vld [vmem:[%s470_s20 + $0xb8] sm:$0xff]  ;;  %v198_v26 = vld [vmem:[%s470_s20 + $0xc0] sm:$0xff] }
  0x19   : > { %321 = vst.msk [vmem:[%s498_s25 + $0x20] sm:$0xff] %vm316_vm0, %v288_v35  ;;  %322 = vst.msk [vmem:[%s498_s25 + $0x28] sm:$0xff] %vm316_vm0, %v289_v36  ;;  %v260_v48 = vadd.f32 %v475_v1, %v221_v40  ;;  %v261_v49 = vadd.f32 %v475_v1, %v222_v41  ;;  %v262_v50 = vadd.f32 %v475_v1, %v223_v42  ;;  %v199_v27 = vld [vmem:[%s470_s20 + $0xc8] sm:$0xff]  ;;  %v200_v28 = vld [vmem:[%s470_s20 + $0xd0] sm:$0xff] }
  0x1a   : > { %323 = vst.msk [vmem:[%s498_s25 + $0x30] sm:$0xff] %vm316_vm0, %v290_v39  ;;  %v227_v51 = vmul.f32 %v465_v0, %v188_v38  ;;  %324 = vst.msk [vmem:[%s498_s25 + $0x38] sm:$0xff] %vm316_vm0, %v291_v44  ;;  %v263_v52 = vadd.f32 %v475_v1, %v224_v45  ;;  %v264_v53 = vadd.f32 %v475_v1, %v225_v46  ;;  %v201_v33 = vld [vmem:[%s470_s20 + $0xd8] sm:$0xff]  ;;  %v202_v34 = vld [vmem:[%s470_s20 + $0xe0] sm:$0xff] }
  0x1b   : > { %v265_v54 = vadd.f32 %v475_v1, %v226_v47  ;;  %v228_v55 = vmul.f32 %v465_v0, %v189_v43  ;;  %v292_v59 = vmax.f32 %v260_v48, 0.0  ;;  %v293_v60 = vmax.f32 %v261_v49, 0.0  ;;  %v203_v35 = vld [vmem:[%s470_s20 + $0xe8] sm:$0xff]  ;;  %v204_v40 = vld [vmem:[%s470_s20 + $0xf0] sm:$0xff]  ;;  %v205_v45 = vld [vmem:[%s470_s20 + $0xf8] sm:$0xff] }
  0x1c   : > { %v294_v61 = vmax.f32 %v262_v50, 0.0  ;;  %v266_v62 = vadd.f32 %v475_v1, %v227_v51  ;;  %v295_v4 = vmax.f32 %v263_v52, 0.0  ;;  %v296_v5 = vmax.f32 %v264_v53, 0.0 }
  0x1d   : > { %v297_v6 = vmax.f32 %v265_v54, 0.0  ;;  %v267_v7 = vadd.f32 %v475_v1, %v228_v55  ;;  %325 = vst.msk [vmem:[%s498_s25 + $0x40] sm:$0xff] %vm316_vm0, %v292_v59  ;;  %326 = vst.msk [vmem:[%s498_s25 + $0x48] sm:$0xff] %vm316_vm0, %v293_v60  ;;  %v229_v10 = vmul.f32 %v465_v0, %v190_v56  ;;  %v230_v11 = vmul.f32 %v465_v0, %v191_v57 }
  0x1e   : > { %327 = vst.msk [vmem:[%s498_s25 + $0x50] sm:$0xff] %vm316_vm0, %v294_v61  ;;  %v298_v9 = vmax.f32 %v266_v62, 0.0  ;;  %v231_v12 = vmul.f32 %v465_v0, %v192_v58  ;;  %328 = vst.msk [vmem:[%s498_s25 + $0x58] sm:$0xff] %vm316_vm0, %v295_v4  ;;  %v232_v15 = vmul.f32 %v465_v0, %v193_v63  ;;  %v233_v16 = vmul.f32 %v465_v0, %v194_v2 }
  0x1f   : > { %329 = vst.msk [vmem:[%s498_s25 + $0x60] sm:$0xff] %vm316_vm0, %v296_v5  ;;  %330 = vst.msk [vmem:[%s498_s25 + $0x68] sm:$0xff] %vm316_vm0, %v297_v6  ;;  %v299_v14 = vmax.f32 %v267_v7, 0.0  ;;  %v234_v17 = vmul.f32 %v465_v0, %v195_v3  ;;  %v268_v18 = vadd.f32 %v475_v1, %v229_v10  ;;  %v269_v19 = vadd.f32 %v475_v1, %v230_v11 }
  0x20   : > { %331 = vst.msk [vmem:[%s498_s25 + $0x70] sm:$0xff] %vm316_vm0, %v298_v9  ;;  %v270_v20 = vadd.f32 %v475_v1, %v231_v12  ;;  %v235_v21 = vmul.f32 %v465_v0, %v196_v8  ;;  %v271_v22 = vadd.f32 %v475_v1, %v232_v15  ;;  %v272_v23 = vadd.f32 %v475_v1, %v233_v16 }
  0x21   : > { %332 = vst.msk [vmem:[%s498_s25 + $0x78] sm:$0xff] %vm316_vm0, %v299_v14  ;;  %v273_v24 = vadd.f32 %v475_v1, %v234_v17  ;;  %v236_v25 = vmul.f32 %v465_v0, %v197_v13  ;;  %v300_v29 = vmax.f32 %v268_v18, 0.0  ;;  %v301_v30 = vmax.f32 %v269_v19, 0.0 }
  0x22   : > { %v302_v31 = vmax.f32 %v270_v20, 0.0  ;;  %v274_v32 = vadd.f32 %v475_v1, %v235_v21  ;;  %v303_v36 = vmax.f32 %v271_v22, 0.0  ;;  %v304_v37 = vmax.f32 %v272_v23, 0.0 }
  0x23   : > { %v305_v38 = vmax.f32 %v273_v24, 0.0  ;;  %v275_v39 = vadd.f32 %v475_v1, %v236_v25  ;;  %333 = vst.msk [vmem:[%s498_s25 + $0x80] sm:$0xff] %vm316_vm0, %v300_v29  ;;  %334 = vst.msk [vmem:[%s498_s25 + $0x88] sm:$0xff] %vm316_vm0, %v301_v30  ;;  %v237_v42 = vmul.f32 %v465_v0, %v198_v26  ;;  %v238_v43 = vmul.f32 %v465_v0, %v199_v27 }
  0x24   : > { %335 = vst.msk [vmem:[%s498_s25 + $0x90] sm:$0xff] %vm316_vm0, %v302_v31  ;;  %v306_v41 = vmax.f32 %v274_v32, 0.0  ;;  %v239_v44 = vmul.f32 %v465_v0, %v200_v28  ;;  %336 = vst.msk [vmem:[%s498_s25 + $0x98] sm:$0xff] %vm316_vm0, %v303_v36  ;;  %v240_v47 = vmul.f32 %v465_v0, %v201_v33  ;;  %v241_v48 = vmul.f32 %v465_v0, %v202_v34 }
  0x25   : > { %337 = vst.msk [vmem:[%s498_s25 + $0xa0] sm:$0xff] %vm316_vm0, %v304_v37  ;;  %338 = vst.msk [vmem:[%s498_s25 + $0xa8] sm:$0xff] %vm316_vm0, %v305_v38  ;;  %v307_v46 = vmax.f32 %v275_v39, 0.0  ;;  %v242_v49 = vmul.f32 %v465_v0, %v203_v35  ;;  %v276_v50 = vadd.f32 %v475_v1, %v237_v42  ;;  %v277_v51 = vadd.f32 %v475_v1, %v238_v43 }
  0x26   : > { %339 = vst.msk [vmem:[%s498_s25 + $0xb0] sm:$0xff] %vm316_vm0, %v306_v41  ;;  %v278_v52 = vadd.f32 %v475_v1, %v239_v44  ;;  %v243_v53 = vmul.f32 %v465_v0, %v204_v40  ;;  %v279_v54 = vadd.f32 %v475_v1, %v240_v47  ;;  %v280_v55 = vadd.f32 %v475_v1, %v241_v48 }
  0x27   : > { %340 = vst.msk [vmem:[%s498_s25 + $0xb8] sm:$0xff] %vm316_vm0, %v307_v46  ;;  %v281_v56 = vadd.f32 %v475_v1, %v242_v49  ;;  %v244_v57 = vmul.f32 %v465_v0, %v205_v45  ;;  %v308_v58 = vmax.f32 %v276_v50, 0.0  ;;  %v309_v59 = vmax.f32 %v277_v51, 0.0 }
  0x28   : > { %v310_v60 = vmax.f32 %v278_v52, 0.0  ;;  %v282_v61 = vadd.f32 %v475_v1, %v243_v53  ;;  %v311_v62 = vmax.f32 %v279_v54, 0.0  ;;  %v312_v63 = vmax.f32 %v280_v55, 0.0 }
  0x29   : > { %v313_v2 = vmax.f32 %v281_v56, 0.0  ;;  %v283_v3 = vadd.f32 %v475_v1, %v244_v57  ;;  %341 = vst.msk [vmem:[%s498_s25 + $0xc0] sm:$0xff] %vm316_vm0, %v308_v58  ;;  %342 = vst.msk [vmem:[%s498_s25 + $0xc8] sm:$0xff] %vm316_vm0, %v309_v59 }
  0x2a   : > { %343 = vst.msk [vmem:[%s498_s25 + $0xd0] sm:$0xff] %vm316_vm0, %v310_v60  ;;  %v314_v4 = vmax.f32 %v282_v61, 0.0  ;;  %344 = vst.msk [vmem:[%s498_s25 + $0xd8] sm:$0xff] %vm316_vm0, %v311_v62 }
  0x2b   : > { %345 = vst.msk [vmem:[%s498_s25 + $0xe0] sm:$0xff] %vm316_vm0, %v312_v63  ;;  %346 = vst.msk [vmem:[%s498_s25 + $0xe8] sm:$0xff] %vm316_vm0, %v313_v2  ;;  %v315_v0 = vmax.f32 %v283_v3, 0.0 }
  0x2c   : > { %347 = vst.msk [vmem:[%s498_s25 + $0xf0] sm:$0xff] %vm316_vm0, %v314_v4 }
  0x2d   : > { %348 = vst.msk [vmem:[%s498_s25 + $0xf8] sm:$0xff] %vm316_vm0, %v315_v0 }
  0x2e PF: > { %s13_s12 = sadd.s32 1, %s432_s12  }
  0x2f   : > { %p10_p4 = scmp.ge.s32.totalorder %s13_s12, 4  }
  0x31   :  { %12 = sbr.rel (!%p10_p4) target bundleno = 1 (0x1), region = 62 }

// kernel: conv_block_forward.9
= control target key start
LH: loop header
LB: loop body
LE: loop exit
PB: predicated region body
PF: predicated region fallthrough
CT: control target
= control target key end

     0   :  { %s1296_s18 = smov 0   ;;  %s1298_s19 = smov 0   ;;  %s1464_s0 = inlined_call_operand.vmem [shape: bf16[2,18,18,8], index: 0, kind: input, shape index: {}, may-alias: {0,1,2}]   ;;  %s1465_s1 = inlined_call_operand.vmem [shape: bf16[2,18,18,8], index: 1, kind: input, shape index: {}, may-alias: {0,1,2}]   ;;  %s1466_s2 = inlined_call_operand.vmem [shape: bf16[2,18,18,8], index: 2, kind: input, shape index: {}, may-alias: {0,1,2}]   ;;  %s1467_s3 = inlined_call_operand.vmem [shape: bf16[9,8,8], index: 3, kind: input, shape index: {}]   ;;  %s1468_s4 = inlined_call_operand.vmem [shape: f32[1,8], index: 4, kind: input, shape index: {}]   ;;  %s1469_s5 = inlined_call_operand.vmem [shape: f32[2,16,16,8], index: 5, kind: output, shape index: {}]  }
   0x1   :  { %s1300_s20 = smov 0   ;;  %s1302_s21 = smov 0  }
   0x2   :  { %s1304_s22 = smov 0  }
   0x3 LB: > { %s24_s23 = sadd.s32 1, %s1254_s20  ;;  %s27_s24 = sadd.s32 1, %s1258_s21  ;;  %s1262_s22 = sphi %s1304_s22, %s15_s22   ;;  %s1258_s21 = sphi %s1302_s21, %s1473_s21   ;;  %s1254_s20 = sphi %s1300_s20, %s1472_s20   ;;  %s1250_s19 = sphi %s1298_s19, %s1471_s19   ;;  %s1246_s18 = sphi %s1296_s18, %s1470_s18  }
   0x4   : > { %p25_p0 = scmp.ge.s32.totalorder %s24_s23, 16  ;;  %p1057_p1 = scmp.ge.s32.totalorder %s1262_s22, 1 }
   0x5   : > { %p247_p2 = scmp.lt.s32.totalorder %s1262_s22, 33 }
   0x6   : > { %s1475_s23 = smov (%p25_p0, %s24_s23), 0  ;;  %s1477_s24 = smov (!%p25_p0, %s27_s24), %s1258_s21 }
   0x7   : > { %p248_p3 = pnand %p1057_p1, %p247_p2  ;;  %p29_p4 = scmp.ge.s32.totalorder %s1477_s24, 2 }
   0x8   : > { %v1064_v0 = vld [vmem:[%s1467_s3 + $0x4] sm:$0xf] (!%p248_p3)  ;;  %vm375_vm0 = vcmask (!%p248_p3), 1043456   ;;  %v346_v1 = vld [vmem:[%s1467_s3] sm:$0xf] (!%p248_p3)  ;;  %v1264_v2 = vmov (!%p248_p3), 0.0  }
   0x9   : > { %s1479_s24 = smov (%p29_p4, %s1477_s24), 0  ;;  %251 = sbr.rel (%p248_p3) target bundleno = 285 (0x11d), region = 40 }
   0xa   : > { %1113 = vmatprep.subr.bf16.mxu0 (!%p248_p3), %v1264_v2  ;;  %v377_v3 = vsel (!%p248_p3), %vm375_vm0, %v1064_v0, 0  ;;  %1119 = vmatprep.subr.bf16.mxu1 (!%p248_p3), %v1264_v2  ;;  %v423_v4 = vsel (!%p248_p3), %vm375_vm0, %v346_v1, 0  ;;  %p303_p5 = scmp.lt.s32.totalorder (!%p248_p3), %s1250_s19, 1  ;;  %p305_p6 = scmp.lt.s32.totalorder (!%p248_p3), %s1246_s18, 17  ;;  %vm1265_vm1 = vmmov (!%p248_p3), 0   ;;  %vm371_vm2 = vcmask (!%p248_p3), 64512  }
   0xb   : > { %1114 = vmatpush3.bf16.msra.mxu0 (!%p248_p3), %v377_v3  ;;  %1120 = vmatpush3.bf16.msra.mxu1 (!%p248_p3), %v423_v4  ;;  %s312_s6 = sadd.s32 (!%p248_p3), 1, %s1246_s18  ;;  %s323_s8 = sadd.s32 (!%p248_p3), 2, %s1246_s18  ;;  %v1072_v5 = vld [vmem:[%s1467_s3 + $0xc] sm:$0xf] (!%p248_p3)  ;;  %v1069_v15 = vld [vmem:[%s1467_s3 + $0x8] sm:$0xf] (!%p248_p3) }
   0xc   : > { %1115 = vmatprep.mubr.msk.bf16.mxu0 (!%p248_p3), %vm1265_vm1, %v1264_v2  ;;  %1121 = vmatprep.mubr.msk.bf16.mxu1 (!%p248_p3), %vm1265_vm1, %v1264_v2  ;;  %p315_p7 = scmp.lt.s32.totalorder (!%p248_p3), %s312_s6, 17  ;;  %p326_p8 = scmp.lt.s32.totalorder (!%p248_p3), %s323_s8, 17  ;;  %v538_v10 = vsel (!%p248_p3), %vm375_vm0, %v1072_v5, 0  ;;  %v1079_v16 = vld [vmem:[%s1467_s3 + $0x14] sm:$0xf] (!%p248_p3)  ;;  %v480_v21 = vsel (!%p248_p3), %vm375_vm0, %v1069_v15, 0 }
   0xd   : > { %1125 = vmatprep.subr.bf16.mxu0 (!%p248_p3), %v1264_v2  ;;  %1131 = vmatprep.subr.bf16.mxu1 (!%p248_p3), %v1264_v2  ;;  %vm358_vm3 = vsmask.f32 (!%p248_p3), 7424  ;;  %vm472_vm4 = vcmask (!%p248_p3), 1046528   ;;  %v670_v22 = vsel (!%p248_p3), %vm375_vm0, %v1079_v16, 0  ;;  %v1075_v34 = vld [vmem:[%s1467_s3 + $0x10] sm:$0xf] (!%p248_p3) }
   0xe   : > { %v1085_v45 = vld [vmem:[%s1467_s3 + $0x1c] sm:$0xf] (!%p248_p3)  ;;  %v612_v47 = vsel (!%p248_p3), %vm375_vm0, %v1075_v34, 0  ;;  %v1082_v55 = vld [vmem:[%s1467_s3 + $0x18] sm:$0xf] (!%p248_p3)  ;;  %p336_p9 = scmp.lt.s32.totalorder (!%p248_p3), %s1246_s18, 15 }
   0xf   : > { %v802_v52 = vsel (!%p248_p3), %vm375_vm0, %v1085_v45, 0  ;;  %v728_v59 = vsel (!%p248_p3), %vm375_vm0, %v1082_v55, 0  ;;  %v1089_v62 = vld [vmem:[%s1467_s3 + $0x20] sm:$0xf] (!%p248_p3) }
  0x10   : > { %s1481_s19 = smov (!%p303_p5, %s1250_s19), 1  ;;  %s1483_s6 = smov (!%p315_p7, %s312_s6), 17  ;;  %v860_v1 = vsel %vm375_vm0, %v1089_v62, 0 }
  0x11   : > { %s306_s29 = scalar_select %p305_p6, %s1246_s18, 17 }
  0x12   : > { %s1353_s30 = smul.u32 54, %s1481_s19  ;;  %s1485_s8 = smov (!%p326_p8, %s323_s8), 17 }
  0x13   : > { %s1167_s7 = smul.u32 3, %s306_s29  ;;  %s1487_s18 = smov (!%p336_p9, %s1246_s18), 15 }
  0x14   : > { %s1169_s16 = smul.u32 3, %s1483_s6 }
  0x15   : > { %s309_s9 = sadd.s32 %s1353_s30, %s1167_s7  ;;  %s1170_s28 = smul.u32 3, %s1485_s8 }
  0x16   : > { %s1058_s10 = sshll.u32 %s309_s9, 2  ;;  %s319_s29 = sadd.s32 %s1169_s16, %s1353_s30 }
  0x17   : > { %s311_s15 = scalar_lea.vmem %s1464_s0, %s1058_s10  ;;  %s1059_s6 = sshll.u32 %s319_s29, 2 }
  0x18   : > { %v344_v6 = vld [vmem:[%s311_s15] sm:$0xf]  ;;  %v345_v7 = vld [vmem:[%s311_s15 + $0x4] sm:$0xf]  ;;  %s330_s7 = sadd.s32 %s1170_s28, %s1353_s30  ;;  %s321_s11 = scalar_lea.vmem %s1465_s1, %s1059_s6 }
  0x19   : > { %v1065_v8 = vcombine.low %v344_v6, %v345_v7  ;;  %v1214_v9 = vld [vmem:[%s311_s15 + $0x8] ss:$0 sps:$4 sm:$0x11]   ;;  %v466_v14 = vld [vmem:[%s311_s15] sm:$0xe]  ;;  %s1060_s8 = sshll.u32 %s330_s7, 2 }
  0x1a   : > { %v367_v13 = vshll.u32 %v1214_v9, 16  ;;  %v1070_v19 = vcombine.low %v466_v14, %v345_v7  ;;  %v474_v23 = vrot.slane %v1214_v9, 1  ;;  %v1216_v24 = vld [vmem:[%s321_s11] sm:$0xff]   ;;  %s1385_s14 = scalar_lea.vmem %s1466_s2, %s1060_s8  ;;  %v1218_v30 = vld [vmem:[%s321_s11 + $0x8] ss:$0 sps:$4 sm:$0x11]  }
  0x1b   : > { %v360_v11 = vshrl.u32 %v1065_v8, 16  ;;  %v362_v12 = vshll.u32 %v1065_v8, 16  ;;  %1122 = vmatmul.mubr.msk.bf16.vlgmr.msra.gmra.mrb[0].mxu1 %vm371_vm2, %v1065_v8  ;;  %v583_v26 = vld [vmem:[%s321_s11] sm:$0xf]  ;;  %v584_v27 = vld [vmem:[%s321_s11 + $0x4] sm:$0xf] }
  0x1c   : > { %1132 = vmatpush3.bf16.msra.mxu1 %v538_v10  ;;  %1133 = vmatprep.mubr.msk.bf16.mxu1 %vm1265_vm1, %v1264_v2  ;;  %v369_v18 = vrot.slane %v367_v13, 1  ;;  %v473_v28 = vrot.slane %v1070_v19, 1  ;;  %v1076_v29 = vcombine.low %v583_v26, %v584_v27  ;;  %v657_v31 = vld [vmem:[%s321_s11] sm:$0xe]  ;;  %v664_v36 = vrot.slane %v1218_v30, 1  ;;  %s1061_s29 = sshll.u32 %s1487_s18, 1 }
  0x1d   : > { %v364_v17 = vrot.slane %v362_v12, 1  ;;  %1143 = vmatprep.subr.bf16.mxu1 %v1264_v2  ;;  %v1080_v32 = vcombine.low %v657_v31, %v584_v27  ;;  %v773_v33 = vld [vmem:[%s1385_s14] sm:$0xf]  ;;  %v774_v37 = vld [vmem:[%s1385_s14 + $0x4] sm:$0xf]  ;;  %v604_v44 = vshll.u32 %v1218_v30, 16 }
  0x1e   : > { %v599_v35 = vshll.u32 %v1076_v29, 16  ;;  %v1086_v39 = vcombine.low %v773_v33, %v774_v37  ;;  %v1222_v40 = vld [vmem:[%s1385_s14 + $0x8] ss:$0 sps:$4 sm:$0x11]   ;;  %v475_v41 = vsel %vm472_vm4, %v473_v28, %v474_v23  ;;  %v597_v42 = vshrl.u32 %v1076_v29, 16  ;;  %v1220_v63 = vld [vmem:[%s1385_s14] sm:$0xff]  }
  0x1f   : > { %v365_v20 = vor.u32 %v364_v17, %v360_v11  ;;  %v663_v38 = vrot.slane %v1080_v32, 1  ;;  %v794_v51 = vshll.u32 %v1222_v40, 16  ;;  %v606_v54 = vrot.slane %v604_v44, 1  ;;  %v847_v61 = vld [vmem:[%s1385_s14] sm:$0xe]  ;;  %s1062_s6 = sshll.u32 %s1481_s19, 5 }
  0x20   : > { %v601_v43 = vrot.slane %v599_v35, 1  ;;  %v789_v46 = vshll.u32 %v1086_v39, 16  ;;  %v787_v49 = vshrl.u32 %v1086_v39, 16  ;;  %v1090_v0 = vcombine.low %v847_v61, %v774_v37  ;;  %s340_s7 = sadd.s32 %s1062_s6, %s1061_s29 }
  0x21   : > { %v370_v25 = vsel %vm358_vm3, %v365_v20, %v369_v18  ;;  %v665_v48 = vsel %vm472_vm4, %v663_v38, %v664_v36  ;;  %v796_v57 = vrot.slane %v794_v51, 1  ;;  %v854_v4 = vrot.slane %v1222_v40, 1  ;;  %s1063_s9 = sshll.u32 %s340_s7, 3 }
  0x22   : > { %1116 = vmatmul.mubr.msk.bf16.vlgmr.msra.gmra.mrb[0].mxu0 %vm371_vm2, %v370_v25  ;;  %v791_v50 = vrot.slane %v789_v46, 1  ;;  %v602_v53 = vor.u32 %v601_v43, %v597_v42  ;;  %v853_v3 = vrot.slane %v1090_v0, 1  ;;  %s342_s13 = scalar_lea.vmem %s1469_s5, %s1063_s9 }
  0x23   : > { %1126 = vmatpush3.bf16.msra.mxu0 %v480_v21  ;;  %1127 = vmatprep.mubr.msk.bf16.mxu0 %vm1265_vm1, %v1264_v2 }
  0x24   : > { %1137 = vmatprep.subr.bf16.mxu0 %v1264_v2  ;;  %1134 = vmatmul.mubr.msk.bf16.vlgmr.msra.gmra.mrb[4].mxu1 %vm371_vm2, %v1216_v24  ;;  %v792_v56 = vor.u32 %v791_v50, %v787_v49  ;;  %v607_v58 = vsel %vm358_vm3, %v602_v53, %v606_v54  ;;  %v855_v5 = vsel %vm472_vm4, %v853_v3, %v854_v4 }
  0x25   : > { %1144 = vmatpush3.bf16.msra.mxu1 %v670_v22  ;;  %1145 = vmatprep.mubr.msk.bf16.mxu1 %vm1265_vm1, %v1264_v2 }
  0x26   : > { %1155 = vmatprep.subr.bf16.mxu1 %v1264_v2  ;;  %v797_v60 = vsel %vm358_vm3, %v792_v56, %v796_v57 }
  0x2a   : > { %1128 = vmatmul.mubr.msk.bf16.vlgmr.msra.gmra.mrb[4].mxu0 %vm371_vm2, %v475_v41 }
  0x2b   : > { %1138 = vmatpush3.bf16.msra.mxu0 %v612_v47  ;;  %1139 = vmatprep.mubr.msk.bf16.mxu0 %vm1265_vm1, %v1264_v2 }
  0x2c   : > { %1149 = vmatprep.subr.bf16.mxu0 %v1264_v2  ;;  %1146 = vmatmul.mubr.msk.bf16.vlgmr.msra.gmra.mrb[8].mxu1 %vm371_vm2, %v665_v48 }
  0x2d   : > { %1156 = vmatpush3.bf16.msra.mxu1 %v802_v52  ;;  %1157 = vmatprep.mubr.msk.bf16.mxu1 %vm1265_vm1, %v1264_v2  ;;  %v1092_v52 = vld [vmem:[%s1468_s4] ss:$0 sm:$0xff] }
  0x32   : > { %1140 = vmatmul.mubr.msk.bf16.vlgmr.msra.gmra.mrb[8].mxu0 %vm371_vm2, %v607_v58 }
  0x33   : > { %1150 = vmatpush3.bf16.msra.mxu0 %v728_v59  ;;  %1151 = vmatprep.mubr.msk.bf16.mxu0 %vm1265_vm1, %v1264_v2 }
  0x34   : > { %1161 = vmatprep.subr.bf16.mxu0 %v1264_v2  ;;  %1158 = vmatmul.mubr.msk.bf16.vlgmr.msra.gmra.mrb[12].mxu1 %vm371_vm2, %v797_v60 }
  0x3a   : > { %1152 = vmatmul.mubr.msk.bf16.vlgmr.msra.gmra.mrb[12].mxu0 %vm371_vm2, %v1220_v63 }
  0x3b   : > { %1162 = vmatpush3.bf16.msra.mxu0 %v860_v1  ;;  %1163 = vmatprep.mubr.msk.bf16.mxu0 %vm1265_vm1, %v1264_v2 }
  0x42   : > { %1164 = vmatmul.mubr.msk.bf16.vlgmr.msra.gmra.mrb[16].mxu0 %vm371_vm2, %v855_v5 }
  0xee   : > { %v459_v6 = vpop.f32.mrb[0].mxu1 }
  0xef   : > { %v1123_v7 = vpop.f32.mrb[1].mxu1 }
  0xf0   : > { %v462_v8 = vpop.f32.mrb[2].mxu1 }
  0xf1   : > { %v1124_v9 = vpop.f32.mrb[3].mxu1 }
  0xf5   : > { %v413_v10 = vpop.f32.mrb[0].mxu0 }
  0xf6   : > { %v460_v11 = vadd.f32 %v459_v6, %v413_v10  ;;  %v1117_v12 = vpop.f32.mrb[1].mxu0 }
  0xf7   : > { %v416_v13 = vpop.f32.mrb[2].mxu0  ;;  %v574_v14 = vpop.f32.mrb[4].mxu1 }
  0xf8   : > { %v463_v15 = vadd.f32 %v462_v8, %v416_v13  ;;  %v1118_v16 = vpop.f32.mrb[3].mxu0  ;;  %v1135_v17 = vpop.f32.mrb[5].mxu1 }
  0xf9   : > { %v577_v18 = vpop.f32.mrb[6].mxu1 }
  0xfa   : > { %v1136_v2 = vpop.f32.mrb[7].mxu1 }
  0xfd   : > { %v516_v19 = vpop.f32.mrb[4].mxu0 }
  0xfe   : > { %v523_v20 = vadd.f32 %v516_v19, %v460_v11  ;;  %v1129_v21 = vpop.f32.mrb[5].mxu0 }
  0xff   : > { %v519_v22 = vpop.f32.mrb[6].mxu0  ;;  %v706_v23 = vpop.f32.mrb[8].mxu1 }
 0x100   : > { %v524_v24 = vadd.f32 %v519_v22, %v463_v15  ;;  %v581_v25 = vadd.f32 %v574_v14, %v523_v20  ;;  %v1130_v26 = vpop.f32.mrb[7].mxu0  ;;  %v1147_v27 = vpop.f32.mrb[9].mxu1 }
 0x101   : > { %v709_v28 = vpop.f32.mrb[10].mxu1 }
 0x102   : > { %v582_v29 = vadd.f32 %v577_v18, %v524_v24  ;;  %v1148_v30 = vpop.f32.mrb[11].mxu1 }
 0x105   : > { %v648_v31 = vpop.f32.mrb[8].mxu0 }
 0x106   : > { %v655_v32 = vadd.f32 %v648_v31, %v581_v25  ;;  %v1141_v33 = vpop.f32.mrb[9].mxu0 }
 0x107   : > { %v651_v34 = vpop.f32.mrb[10].mxu0  ;;  %v838_v35 = vpop.f32.mrb[12].mxu1 }
 0x108   : > { %v656_v36 = vadd.f32 %v651_v34, %v582_v29  ;;  %v713_v37 = vadd.f32 %v706_v23, %v655_v32  ;;  %v1142_v38 = vpop.f32.mrb[11].mxu0  ;;  %v1159_v39 = vpop.f32.mrb[13].mxu1 }
 0x109   : > { %v841_v40 = vpop.f32.mrb[14].mxu1 }
 0x10a   : > { %v714_v41 = vadd.f32 %v709_v28, %v656_v36  ;;  %v1160_v42 = vpop.f32.mrb[15].mxu1 }
 0x10d   : > { %v764_v43 = vpop.f32.mrb[12].mxu0 }
 0x10e   : > { %v771_v44 = vadd.f32 %v764_v43, %v713_v37  ;;  %v1153_v45 = vpop.f32.mrb[13].mxu0 }
 0x10f   : > { %v767_v46 = vpop.f32.mrb[14].mxu0 }
 0x110   : > { %v772_v47 = vadd.f32 %v767_v46, %v714_v41  ;;  %v845_v48 = vadd.f32 %v838_v35, %v771_v44  ;;  %v1154_v49 = vpop.f32.mrb[15].mxu0 }
 0x112   : > { %v846_v50 = vadd.f32 %v841_v40, %v772_v47 }
 0x115   : > { %v896_v51 = vpop.f32.mrb[16].mxu0 }
 0x116   : > { %v903_v53 = vadd.f32 %v896_v51, %v845_v48  ;;  %v1165_v54 = vpop.f32.mrb[17].mxu0 }
 0x117   : > { %v899_v55 = vpop.f32.mrb[18].mxu0 }
 0x118   : > { %v912_v56 = vadd.f32 %v1092_v52, %v903_v53  ;;  %v904_v57 = vadd.f32 %v899_v55, %v846_v50  ;;  %v1166_v58 = vpop.f32.mrb[19].mxu0 }
 0x11a   : > { %914 = vst.msk [vmem:[%s342_s13] sm:$0xff] %vm371_vm2, %v912_v56  ;;  %v913_v59 = vadd.f32 %v1092_v52, %v904_v57 }
 0x11c   : > { %915 = vst.msk [vmem:[%s342_s13 + $0x8] sm:$0xff] %vm371_vm2, %v913_v59 }
 0x11d PF: > { %s15_s22 = sadd.s32 1, %s1262_s22   ;;  %s1470_s18 = smov %s1254_s20 }
 0x11e   : > { %p12_p10 = scmp.ge.s32.totalorder %s15_s22, 34   ;;  %s1471_s19 = smov %s1258_s21 }
 0x11f   : > { %s1472_s20 = smov %s1475_s23  ;;  %s1473_s21 = smov %s1479_s24 }
 0x120   :  { %14 = sbr.rel (!%p12_p10) target bundleno = 3 (0x3), region = 84 }

</bundles_post_ra>
